<compile_context>
chip_gen: v7x
topology: tpu7x:2x2x1
jax: 0.10.0
libtpu: 0.0.40
codegen_flags: <defaults>
</compile_context>

<pallas_src>
import jax
import jax.numpy as jnp
from jax.experimental import pallas as pl
from jax.experimental.pallas import tpu as pltpu

OBS_DIM = 4          # CartPole-v1 observation_space.shape = (4,)
ACTION_SPACE = 2     # CartPole-v1 action_space.n
FC1_DIMS = 1024
FC2_DIMS = 512
OUT_PAD = 128        # fc3 output padded to a full lane width (unmasked vst)

_SUBLANE = 8         # f32 sublane granularity
_BATCH_TILE = 512    # max batch tile (amortizes ~0.35us/step grid overhead)


def _mlp_kernel(x_ref, w1_ref, b1_ref, w2_ref, b2_ref, w3_ref, b3_ref, o_ref):
    # bf16 operands on the MXU, f32 accumulation, f32 bias/ReLU epilogues.
    x = x_ref[...].astype(jnp.bfloat16)                               # (TB, 4)
    h1 = jnp.dot(x, w1_ref[...], preferred_element_type=jnp.float32)
    h1 = jnp.maximum(h1 + b1_ref[...], 0.0)                           # ReLU(fc1)
    h2 = jnp.dot(h1.astype(jnp.bfloat16), w2_ref[...],
                 preferred_element_type=jnp.float32)
    h2 = jnp.maximum(h2 + b2_ref[...], 0.0)                           # ReLU(fc2)
    out = jnp.dot(h2.astype(jnp.bfloat16), w3_ref[...],
                  preferred_element_type=jnp.float32)
    o_ref[...] = (out + b3_ref[...]).astype(o_ref.dtype)              # fc3 (lane-padded)


def _round_up(n, m):
    return ((n + m - 1) // m) * m


def _batch_tiling(B):
    """Pick (batch_tile, padded_batch).

    Tiny batches: one sublane-padded tile.  Larger batches: <=512-row tiles,
    capped so the grid has >= 2 steps (both v7x TensorCores get work under the
    "parallel" grid axis)."""
    pB = _round_up(B, _SUBLANE)
    if pB <= 128:
        return pB, pB
    tb = min(_BATCH_TILE, _round_up(pl.cdiv(pB, 2), _SUBLANE))
    pB = _round_up(pB, tb)
    return tb, pB


def prepare_params(params):
    """Convert master f32 params into the kernel's persistent streaming format.

    Call ONCE at init (inference) or once per optimizer step (training), not
    per forward call: hoisting the f32->bf16 cast out of the forward path is
    the main HBM-traffic fix for this mem-bound kernel.  Also zero-pads the
    fc3 weight/bias to 128 output lanes so the kernel's store is lane-dense.
    """
    w3p = jnp.zeros((FC2_DIMS, OUT_PAD), jnp.bfloat16)
    w3p = w3p.at[:, :ACTION_SPACE].set(params["w3"].astype(jnp.bfloat16))
    b3p = jnp.zeros((1, OUT_PAD), jnp.float32)
    b3p = b3p.at[:, :ACTION_SPACE].set(params["b3"])
    return {
        "w1": params["w1"].astype(jnp.bfloat16),
        "b1": params["b1"],
        "w2": params["w2"].astype(jnp.bfloat16),
        "b2": params["b2"],
        "w3": w3p,
        "b3": b3p,
    }


def network_forward(x, kparams):
    """x: (B, 4) f32; kparams: output of prepare_params() (bf16 weights,
    f32 biases, fc3 lane-padded).  Returns (B, ACTION_SPACE) f32."""
    w1, b1 = kparams["w1"], kparams["b1"]
    w2, b2 = kparams["w2"], kparams["b2"]
    w3, b3 = kparams["w3"], kparams["b3"]

    B = x.shape[0]
    tb, pB = _batch_tiling(B)
    if pB != B:
        # x is only 16 B/row; the pad copy is negligible even at training sizes.
        x = jnp.pad(x, ((0, pB - B), (0, 0)))

    grid = (pB // tb,)

    # Weights/biases: full-array blocks, constant block index across the batch
    # grid -> DMA'd once, VMEM-resident for all batch tiles.
    full = lambda a: pl.BlockSpec(a.shape, lambda i: (0,) * a.ndim)

    weight_bytes = (w1.size + w2.size + w3.size) * 2 \
                 + (b1.size + b2.size + b3.size) * 4
    io_bytes = pB * OBS_DIM * 4 + pB * OUT_PAD * 4
    cost = pl.CostEstimate(
        flops=2 * pB * (OBS_DIM * FC1_DIMS
                        + FC1_DIMS * FC2_DIMS
                        + FC2_DIMS * OUT_PAD),
        transcendentals=0,
        bytes_accessed=weight_bytes + io_bytes,
    )

    out_padded = pl.pallas_call(
        _mlp_kernel,
        out_shape=jax.ShapeDtypeStruct((pB, OUT_PAD), jnp.float32),
        grid=grid,
        in_specs=[
            pl.BlockSpec((tb, OBS_DIM), lambda i: (i, 0)),
            full(w1), full(b1), full(w2), full(b2), full(w3), full(b3),
        ],
        out_specs=pl.BlockSpec((tb, OUT_PAD), lambda i: (i, 0)),
        compiler_params=pltpu.CompilerParams(
            dimension_semantics=("parallel",),
            vmem_limit_bytes=32 << 20,   # ~8 MiB working set at tb=512
        ),
        cost_estimate=cost,
    )(x, w1, b1, w2, b2, w3, b3)
    return out_padded[:B, :ACTION_SPACE]


def init_params(key):
    """Deterministic init mirroring torch.nn.Linear default:
    U(-1/sqrt(fan_in), 1/sqrt(fan_in)) for both weight and bias."""
    def linear(k, fan_in, fan_out):
        kw, kb = jax.random.split(k)
        bound = 1.0 / jnp.sqrt(jnp.float32(fan_in))
        w = jax.random.uniform(kw, (fan_in, fan_out), jnp.float32, -bound, bound)
        b = jax.random.uniform(kb, (1, fan_out), jnp.float32, -bound, bound)
        return w, b

    k1, k2, k3 = jax.random.split(key, 3)
    w1, b1 = linear(k1, OBS_DIM, FC1_DIMS)
    w2, b2 = linear(k2, FC1_DIMS, FC2_DIMS)
    w3, b3 = linear(k3, FC2_DIMS, ACTION_SPACE)
    return {"w1": w1, "b1": b1, "w2": w2, "b2": b2, "w3": w3, "b3": b3}


def _reference_forward_bf16(x, p):
    """Mirrors the kernel math exactly (bf16 operands, f32 accumulation)."""
    bf = jnp.bfloat16
    h1 = jnp.dot(x.astype(bf), p["w1"].astype(bf),
                 preferred_element_type=jnp.float32) + p["b1"]
    h1 = jnp.maximum(h1, 0.0)
    h2 = jnp.dot(h1.astype(bf), p["w2"].astype(bf),
                 preferred_element_type=jnp.float32) + p["b2"]
    h2 = jnp.maximum(h2, 0.0)
    return jnp.dot(h2.astype(bf), p["w3"].astype(bf),
                   preferred_element_type=jnp.float32) + p["b3"]


def _reference_forward_f32(x, p):
    h1 = jnp.maximum(x @ p["w1"] + p["b1"], 0.0)
    h2 = jnp.maximum(h1 @ p["w2"] + p["b2"], 0.0)
    return h2 @ p["w3"] + p["b3"]


if __name__ == "__main__":
    key = jax.random.PRNGKey(0)
    kp, kx = jax.random.split(key)
    params = init_params(kp)
    kernel_params = prepare_params(params)   # persistent bf16/padded shadow

    batch = 2
    x = jax.random.normal(kx, (batch, OBS_DIM), jnp.float32)

    out = jax.block_until_ready(network_forward(x, kernel_params))
    assert out.shape == (batch, ACTION_SPACE)

    ref_bf16 = _reference_forward_bf16(x, params)   # same math as the kernel
    ref_f32 = _reference_forward_f32(x, params)     # original f32 semantics
    assert jnp.allclose(out, ref_bf16, atol=1e-2, rtol=1e-2), "mismatch vs bf16 reference"
    assert jnp.allclose(out, ref_f32, atol=1e-1, rtol=1e-1), "mismatch vs f32 reference"

    print("KERNEL_OK")
</pallas_src>

<mosaic_0001>
module attributes {stable_mosaic.version = 11 : i64} {
  func.func @_mlp_kernel(%arg0: i32, %arg1: memref<8x4xf32, #tpu.memory_space<vmem>>, %arg2: memref<4x1024xbf16, #tpu.memory_space<vmem>>, %arg3: memref<1x1024xf32, #tpu.memory_space<vmem>>, %arg4: memref<1024x512xbf16, #tpu.memory_space<vmem>>, %arg5: memref<1x512xf32, #tpu.memory_space<vmem>>, %arg6: memref<512x128xbf16, #tpu.memory_space<vmem>>, %arg7: memref<1x128xf32, #tpu.memory_space<vmem>>, %arg8: memref<8x128xf32, #tpu.memory_space<vmem>>) attributes {dimension_semantics = [#tpu.dimension_semantics<parallel>], iteration_bounds = array<i64: 1>, scalar_prefetch = 0 : i64, scratch_operands = 0 : i64, tpu.core_type = #tpu.core_type<tc>, window_params = [{transform_indices = @transform_0, window_bounds = array<i64: 8, 4>}, {pipeline_mode = #tpu.pipeline_mode<synchronous>, transform_indices = @transform_1, window_bounds = array<i64: 4, 1024>}, {pipeline_mode = #tpu.pipeline_mode<synchronous>, transform_indices = @transform_2, window_bounds = array<i64: 1, 1024>}, {pipeline_mode = #tpu.pipeline_mode<synchronous>, transform_indices = @transform_3, window_bounds = array<i64: 1024, 512>}, {pipeline_mode = #tpu.pipeline_mode<synchronous>, transform_indices = @transform_4, window_bounds = array<i64: 1, 512>}, {pipeline_mode = #tpu.pipeline_mode<synchronous>, transform_indices = @transform_5, window_bounds = array<i64: 512, 128>}, {pipeline_mode = #tpu.pipeline_mode<synchronous>, transform_indices = @transform_6, window_bounds = array<i64: 1, 128>}, {transform_indices = @transform_7, window_bounds = array<i64: 8, 128>}]} {
    %c0 = arith.constant 0 : index
    %c0_0 = arith.constant 0 : index
    %0 = vector.load %arg1[%c0, %c0_0] : memref<8x4xf32, #tpu.memory_space<vmem>>, vector<8x4xf32>
    %1 = arith.truncf %0 : vector<8x4xf32> to vector<8x4xbf16>
    %c0_1 = arith.constant 0 : index
    %c0_2 = arith.constant 0 : index
    %2 = vector.load %arg2[%c0_1, %c0_2] : memref<4x1024xbf16, #tpu.memory_space<vmem>>, vector<4x1024xbf16>
    %cst = arith.constant dense<0.000000e+00> : vector<8x1024xf32>
    %3 = tpu.matmul %1, %2, %cst {dimension_numbers = #tpu.dot_dimension_numbers<[1], [0], [0], [1], [0, 0, 1, 1], [], []>} : vector<8x4xbf16>, vector<4x1024xbf16>, vector<8x1024xf32> -> vector<8x1024xf32>
    %c0_3 = arith.constant 0 : index
    %c0_4 = arith.constant 0 : index
    %4 = vector.load %arg3[%c0_3, %c0_4] : memref<1x1024xf32, #tpu.memory_space<vmem>>, vector<1x1024xf32>
    %5 = vector.broadcast %4 : vector<1x1024xf32> to vector<8x1024xf32>
    %6 = arith.addf %3, %5 : vector<8x1024xf32>
    %cst_5 = arith.constant 0.000000e+00 : f32
    %7 = vector.broadcast %cst_5 : f32 to vector<8x1024xf32>
    %8 = arith.maximumf %6, %7 : vector<8x1024xf32>
    %9 = arith.truncf %8 : vector<8x1024xf32> to vector<8x1024xbf16>
    %c0_6 = arith.constant 0 : index
    %c0_7 = arith.constant 0 : index
    %10 = vector.load %arg4[%c0_6, %c0_7] : memref<1024x512xbf16, #tpu.memory_space<vmem>>, vector<1024x512xbf16>
    %cst_8 = arith.constant dense<0.000000e+00> : vector<8x512xf32>
    %11 = tpu.matmul %9, %10, %cst_8 {dimension_numbers = #tpu.dot_dimension_numbers<[1], [0], [0], [1], [0, 0, 1, 1], [], []>} : vector<8x1024xbf16>, vector<1024x512xbf16>, vector<8x512xf32> -> vector<8x512xf32>
    %c0_9 = arith.constant 0 : index
    %c0_10 = arith.constant 0 : index
    %12 = vector.load %arg5[%c0_9, %c0_10] : memref<1x512xf32, #tpu.memory_space<vmem>>, vector<1x512xf32>
    %13 = vector.broadcast %12 : vector<1x512xf32> to vector<8x512xf32>
    %14 = arith.addf %11, %13 : vector<8x512xf32>
    %cst_11 = arith.constant 0.000000e+00 : f32
    %15 = vector.broadcast %cst_11 : f32 to vector<8x512xf32>
    %16 = arith.maximumf %14, %15 : vector<8x512xf32>
    %17 = arith.truncf %16 : vector<8x512xf32> to vector<8x512xbf16>
    %c0_12 = arith.constant 0 : index
    %c0_13 = arith.constant 0 : index
    %18 = vector.load %arg6[%c0_12, %c0_13] : memref<512x128xbf16, #tpu.memory_space<vmem>>, vector<512x128xbf16>
    %cst_14 = arith.constant dense<0.000000e+00> : vector<8x128xf32>
    %19 = tpu.matmul %17, %18, %cst_14 {dimension_numbers = #tpu.dot_dimension_numbers<[1], [0], [0], [1], [0, 0, 1, 1], [], []>} : vector<8x512xbf16>, vector<512x128xbf16>, vector<8x128xf32> -> vector<8x128xf32>
    %c0_15 = arith.constant 0 : index
    %c0_16 = arith.constant 0 : index
    %20 = vector.load %arg7[%c0_15, %c0_16] : memref<1x128xf32, #tpu.memory_space<vmem>>, vector<1x128xf32>
    %21 = vector.broadcast %20 : vector<1x128xf32> to vector<8x128xf32>
    %22 = arith.addf %19, %21 : vector<8x128xf32>
    %c0_17 = arith.constant 0 : index
    %c0_18 = arith.constant 0 : index
    %23 = vector.load %arg8[%c0_17, %c0_18] : memref<8x128xf32, #tpu.memory_space<vmem>>, vector<8x128xf32>
    tpu.vector_store %arg8[%c0_17, %c0_18], %22 {strides = array<i32>} : memref<8x128xf32, #tpu.memory_space<vmem>>, vector<8x128xf32>,
    return
  }
  func.func @transform_0(%arg0: i32) -> (i32, i32) {
    %c0_i32 = arith.constant 0 : i32
    %c0_i32_0 = arith.constant 0 : i32
    return %arg0, %c0_i32 : i32, i32
  }
  func.func @transform_1(%arg0: i32) -> (i32, i32) {
    %c0_i32 = arith.constant 0 : i32
    %c0_i32_0 = arith.constant 0 : i32
    %c0_i32_1 = arith.constant 0 : i32
    return %c0_i32, %c0_i32_0 : i32, i32
  }
  func.func @transform_2(%arg0: i32) -> (i32, i32) {
    %c0_i32 = arith.constant 0 : i32
    %c0_i32_0 = arith.constant 0 : i32
    %c0_i32_1 = arith.constant 0 : i32
    return %c0_i32, %c0_i32_0 : i32, i32
  }
  func.func @transform_3(%arg0: i32) -> (i32, i32) {
    %c0_i32 = arith.constant 0 : i32
    %c0_i32_0 = arith.constant 0 : i32
    %c0_i32_1 = arith.constant 0 : i32
    return %c0_i32, %c0_i32_0 : i32, i32
  }
  func.func @transform_4(%arg0: i32) -> (i32, i32) {
    %c0_i32 = arith.constant 0 : i32
    %c0_i32_0 = arith.constant 0 : i32
    %c0_i32_1 = arith.constant 0 : i32
    return %c0_i32, %c0_i32_0 : i32, i32
  }
  func.func @transform_5(%arg0: i32) -> (i32, i32) {
    %c0_i32 = arith.constant 0 : i32
    %c0_i32_0 = arith.constant 0 : i32
    %c0_i32_1 = arith.constant 0 : i32
    return %c0_i32, %c0_i32_0 : i32, i32
  }
  func.func @transform_6(%arg0: i32) -> (i32, i32) {
    %c0_i32 = arith.constant 0 : i32
    %c0_i32_0 = arith.constant 0 : i32
    %c0_i32_1 = arith.constant 0 : i32
    return %c0_i32, %c0_i32_0 : i32, i32
  }
  func.func @transform_7(%arg0: i32) -> (i32, i32) {
    %c0_i32 = arith.constant 0 : i32
    %c0_i32_0 = arith.constant 0 : i32
    return %arg0, %c0_i32 : i32, i32
  }
}

</mosaic_0001>

<bundles_post_ra>
// kernel: tpu_custom_call.1
= control target key start
LH: loop header
LB: loop body
LE: loop exit
PB: predicated region body
PF: predicated region fallthrough
CT: control target
= control target key end

     0   :  { %12 = vsyncpa [#allocation3], 0  ;;  %s3677_s0 = inlined_call_operand.vmem [shape: f32[8,4], index: 0, kind: input, shape index: {}]   ;;  %s3678_s1 = inlined_call_operand.hbm [shape: bf16[4,1024], index: 1, kind: input, shape index: {}]   ;;  %s3679_s2 = inlined_call_operand.vmem [shape: f32[1,1024], index: 2, kind: input, shape index: {}]   ;;  %s3680_s3 = inlined_call_operand.hbm [shape: bf16[1024,512], index: 3, kind: input, shape index: {}]   ;;  %s3681_s4 = inlined_call_operand.vmem [shape: f32[1,512], index: 4, kind: input, shape index: {}]   ;;  %s3682_s5 = inlined_call_operand.hbm [shape: bf16[512,128], index: 5, kind: input, shape index: {}]   ;;  %s3683_s6 = inlined_call_operand.vmem [shape: f32[1,128], index: 6, kind: input, shape index: {}]   ;;  %s3684_s7 = inlined_call_operand.hbm [shape: f32[8,128], index: 7, kind: output, shape index: {}]  }
   0x1   :  { %13 = vsyncpa [#allocation6], 0 }
   0x2   :  { %14 = vsyncpa [#allocation4], 0  ;;  %s3503_s24 = smov [#allocation5]   ;;  %s3409_s28 = scalar_lea.hbm %s3680_s3, 32768 }
   0x3   :  { %s34_s25 = sshll.u32 %s3503_s24, 4  ;;  %p3410_p0 = scmp.ne.s32.totalorder %s3680_s3, %s3409_s28  ;;  %s35_s25 = int_to_ptr.vmem [resolvable:$true] %s34_s25 }
   0x4   :  { %p3413_p1 = scmp.lt.u32.totalorder %s3409_s28, %s3680_s3 }
   0x6   :  { %p3415_p2 = pnand %p3413_p1, %p3410_p0 }
   0x8   :  { %3418 = shalt.err (!%p3415_p2)
}
   0x9   :  { %s3419_s10 = scalar_lea.vmem %s35_s25, 32768  ;;  %p3424_p4 = scmp.lt.s32.totalorder %s35_s25, %s35_s25 }
   0xa   :  { %p3420_p3 = scmp.ne.s32.totalorder %s35_s25, %s3419_s10  ;;  %p3425_p5 = scmp.lt.s32.totalorder %s3419_s10, %s3419_s10 }
   0xc   :  { %p3426_p6 = por %p3425_p5, %p3424_p4 }
   0xe   :  { %p3427_p7 = pnand %p3426_p6, %p3420_p3 }
  0x10   :  { %3430 = shalt.err (!%p3427_p7)
}
  0x11   :  { %s3504_s11 = smov 256   ;;  %s3505_s12 = smov 16  }
  0x12   :  { %40 = dma.hbm_to_vmem [thread:$0]  %s3680_s3, 32768, %s35_s25, [#allocation6], %s3504_s11, %s3504_s11, %s3505_s12  }
  0x13   :  { %s3506_s15 = smov [#allocation2]   ;;  %s3507_s17 = smov [#allocation7]  }
  0x14   :  { %s23_s16 = sshll.u32 %s3506_s15, 4  ;;  %s48_s18 = sshll.u32 %s3507_s17, 4  ;;  %s24_s16 = int_to_ptr.vmem [resolvable:$true] %s23_s16  ;;  %s49_s18 = int_to_ptr.vmem [resolvable:$true] %s48_s18 }
  0x15   :  { %s3431_s21 = scalar_lea.hbm %s3678_s1, 256 }
  0x16   :  { %p3432_p8 = scmp.ne.s32.totalorder %s3678_s1, %s3431_s21  ;;  %p3435_p9 = scmp.lt.u32.totalorder %s3431_s21, %s3678_s1 }
  0x18   :  { %p3437_p10 = pnand %p3435_p9, %p3432_p8 }
  0x1a   :  { %3440 = shalt.err (!%p3437_p10)
}
  0x1b   :  { %s3441_s3 = scalar_lea.vmem %s24_s16, 256  ;;  %p3446_p12 = scmp.lt.s32.totalorder %s24_s16, %s24_s16 }
  0x1c   :  { %p3442_p11 = scmp.ne.s32.totalorder %s24_s16, %s3441_s3  ;;  %p3447_p13 = scmp.lt.s32.totalorder %s3441_s3, %s3441_s3 }
  0x1e   :  { %p3448_p0 = por %p3447_p13, %p3446_p12 }
  0x20   :  { %p3449_p1 = pnand %p3448_p0, %p3442_p11 }
  0x22   :  { %3452 = shalt.err (!%p3449_p1)
}
  0x23   :  { %26 = dma.hbm_to_vmem [thread:$0]  %s3678_s1, 256, %s24_s16, [#allocation3]  }
  0x24   :  { %s3453_s30 = scalar_lea.hbm %s3682_s5, 4096 }
  0x25   :  { %p3454_p2 = scmp.ne.s32.totalorder %s3682_s5, %s3453_s30  ;;  %p3457_p3 = scmp.lt.u32.totalorder %s3453_s30, %s3682_s5 }
  0x27   :  { %p3459_p4 = pnand %p3457_p3, %p3454_p2 }
  0x29   :  { %3462 = shalt.err (!%p3459_p4)
}
  0x2a   :  { %s3463_s12 = scalar_lea.vmem %s49_s18, 4096  ;;  %p3468_p6 = scmp.lt.s32.totalorder %s49_s18, %s49_s18 }
  0x2b   :  { %p3464_p5 = scmp.ne.s32.totalorder %s49_s18, %s3463_s12  ;;  %p3469_p7 = scmp.lt.s32.totalorder %s3463_s12, %s3463_s12 }
  0x2d   :  { %p3470_p8 = por %p3469_p7, %p3468_p6 }
  0x2f   :  { %p3471_p9 = pnand %p3470_p8, %p3464_p5 }
  0x31   :  { %3474 = shalt.err (!%p3471_p9)
}
  0x32   :  { %s3508_s1 = smov 64   ;;  %s3509_s13 = smov 4  }
  0x33   :  { %54 = dma.hbm_to_vmem [thread:$0]  %s3682_s5, 4096, %s49_s18, [#allocation6], %s3508_s1, %s3508_s1, %s3509_s13  }
  0x34   :  { %3497 = dma.done.wait [#allocation3], 256  }
  0x35   :  { %3498 = vsyncadd [#allocation3], 4294967040 }
  0x36   :  { %3499 = dma.done.wait [#allocation6], 36864  }
  0x37   :  { %3500 = vsyncadd [#allocation6], 4294930432  ;;  %v73_v0 = vlaneseq  ;;  %v3510_v1 = vmov 1983009808   ;;  %v3511_v3 = vmov 0   ;;  %v69_v7 = vld [vmem:[#allocation2] sm:$0xff] }
  0x38   :  { %v117_v2 = vunpack.c.l.s4 %v3510_v1  ;;  %210 = vmatprep.mubr.bf16.mxu0 %v3511_v3  ;;  %251 = vmatprep.mubr.bf16.mxu1 %v3511_v3  ;;  %vm153_vm0 = vcmask 1041408   ;;  %v70_v8 = vld [vmem:[#allocation2 + $0x8] sm:$0xff]  ;;  %v115_v10 = vcombine.high %v69_v7, %v69_v7  ;;  %v67_v12 = vld [vmem:[%s3677_s0] sm:$0xff]  ;;  %vm149_vm1 = vcmask 31744   ;;  %v2995_v24 = vld [vmem:[#allocation5 + $0x4] ss:$16 sps:$4 sm:$0xff]  }
  0x39   :  { %v3589_v4 = vshrl.u32 %v73_v0, 7  ;;  %v132_v13 = vcombine.high %v70_v8, %v70_v8  ;;  %v68_v19 = vpack.c.bf16 %v67_v12, %v67_v12  ;;  %v2998_v26 = vld [vmem:[#allocation5 + $0xc] ss:$16 sps:$4 sm:$0xff]   ;;  %v2993_v27 = vld [vmem:[#allocation5] ss:$16 sps:$4 sm:$0xff]   ;;  %s3512_s20 = smov [#allocation8]  }
  0x3a   :  { %v118_v5 = vunpack.c.0.s8 %v117_v2  ;;  %v3001_v28 = vld [vmem:[#allocation5 + $0x24] ss:$16 sps:$4 sm:$0xff]   ;;  %v2996_v29 = vld [vmem:[#allocation5 + $0x8] ss:$16 sps:$4 sm:$0xff]   ;;  %v3004_v30 = vld [vmem:[#allocation5 + $0x2c] ss:$16 sps:$4 sm:$0xff]  }
  0x3b   :  { %v2999_v31 = vld [vmem:[#allocation5 + $0x20] ss:$16 sps:$4 sm:$0xff]   ;;  %v3007_v32 = vld [vmem:[#allocation5 + $0x44] ss:$16 sps:$4 sm:$0xff]   ;;  %v3002_v33 = vld [vmem:[#allocation5 + $0x28] ss:$16 sps:$4 sm:$0xff]  }
  0x3c   :  { %v121_v6 = vsub.s32 %v118_v5, %v3589_v4  ;;  %v3010_v34 = vld [vmem:[#allocation5 + $0x4c] ss:$16 sps:$4 sm:$0xff]   ;;  %v3005_v35 = vld [vmem:[#allocation5 + $0x40] ss:$16 sps:$4 sm:$0xff]   ;;  %v3013_v36 = vld [vmem:[#allocation5 + $0x64] ss:$16 sps:$4 sm:$0xff]  }
  0x3d   :  { %v3008_v37 = vld [vmem:[#allocation5 + $0x48] ss:$16 sps:$4 sm:$0xff]   ;;  %v3016_v38 = vld [vmem:[#allocation5 + $0x6c] ss:$16 sps:$4 sm:$0xff]   ;;  %v3011_v39 = vld [vmem:[#allocation5 + $0x60] ss:$16 sps:$4 sm:$0xff]  }
  0x3e   :  { %v122_v9 = vrot.slane %v69_v7, %v121_v6  ;;  %v139_v11 = vrot.slane %v70_v8, %v121_v6  ;;  %v129_v16 = vrot.slane %v115_v10, %v121_v6  ;;  %v146_v18 = vrot.slane %v132_v13, %v121_v6  ;;  %v3019_v40 = vld [vmem:[#allocation5 + $0x84] ss:$16 sps:$4 sm:$0xff]   ;;  %v3014_v41 = vld [vmem:[#allocation5 + $0x68] ss:$16 sps:$4 sm:$0xff]   ;;  %v3022_v42 = vld [vmem:[#allocation5 + $0x8c] ss:$16 sps:$4 sm:$0xff]  }
  0x3f   :  { %v3017_v43 = vld [vmem:[#allocation5 + $0x80] ss:$16 sps:$4 sm:$0xff]   ;;  %v3025_v44 = vld [vmem:[#allocation5 + $0xa4] ss:$16 sps:$4 sm:$0xff]   ;;  %v3020_v45 = vld [vmem:[#allocation5 + $0x88] ss:$16 sps:$4 sm:$0xff]  }
  0x40   :  { %v130_v14 = vcombine.high %v122_v9, %v122_v9  ;;  %v155_v15 = vsel %vm153_vm0, %v122_v9, 0  ;;  %v147_v17 = vcombine.high %v139_v11, %v139_v11  ;;  %v131_v20 = vcombine.high %v129_v16, %v129_v16  ;;  %v3028_v46 = vld [vmem:[#allocation5 + $0xac] ss:$16 sps:$4 sm:$0xff]   ;;  %v3023_v47 = vld [vmem:[#allocation5 + $0xa0] ss:$16 sps:$4 sm:$0xff]   ;;  %s2602_s21 = sshll.u32 %s3512_s20, 4  ;;  %s2603_s21 = int_to_ptr.vmem [resolvable:$true] %s2602_s21 }
  0x41   :  { %v161_v21 = vsel %vm153_vm0, %v129_v16, 0  ;;  %v148_v22 = vcombine.high %v146_v18, %v146_v18  ;;  %v167_v23 = vsel %vm153_vm0, %v139_v11, 0  ;;  %v173_v25 = vsel %vm153_vm0, %v146_v18, 0  ;;  %v3031_v48 = vld [vmem:[#allocation5 + $0xc4] ss:$16 sps:$4 sm:$0xff]   ;;  %s3475_s22 = scalar_lea.vmem %s2603_s21, 128  ;;  %p3480_p11 = scmp.lt.s32.totalorder %s2603_s21, %s2603_s21 }
  0x42   :  { %2612 = vmatprep.subr.msk.bf16.mxu0 %vm153_vm0, %v130_v14  ;;  %2614 = vmatprep.subr.msk.bf16.mxu1 %vm153_vm0, %v131_v20  ;;  %v3026_v49 = vld [vmem:[#allocation5 + $0xa8] ss:$16 sps:$4 sm:$0xff]   ;;  %v3029_v50 = vld [vmem:[#allocation5 + $0xc0] ss:$16 sps:$4 sm:$0xff]   ;;  %v3034_v51 = vld [vmem:[#allocation5 + $0xcc] ss:$16 sps:$4 sm:$0xff]   ;;  %p3476_p10 = scmp.ne.s32.totalorder %s2603_s21, %s3475_s22  ;;  %p3481_p12 = scmp.lt.s32.totalorder %s3475_s22, %s3475_s22 }
  0x43   :  { %179 = vmatpush1.bf16.msra.mxu0 %v155_v15  ;;  %220 = vmatpush1.bf16.msra.mxu1 %v161_v21  ;;  %v3032_v52 = vld [vmem:[#allocation5 + $0xc8] ss:$16 sps:$4 sm:$0xff]   ;;  %v3037_v53 = vld [vmem:[#allocation5 + $0xe4] ss:$16 sps:$4 sm:$0xff]   ;;  %v3040_v54 = vld [vmem:[#allocation5 + $0xec] ss:$16 sps:$4 sm:$0xff]  }
  0x44   :  { %2616 = vmatprep.subr.msk.bf16.mxu0 %vm153_vm0, %v147_v17  ;;  %2618 = vmatprep.subr.msk.bf16.mxu1 %vm153_vm0, %v148_v22  ;;  %v3035_v55 = vld [vmem:[#allocation5 + $0xe0] ss:$16 sps:$4 sm:$0xff]   ;;  %v3043_v56 = vld [vmem:[#allocation5 + $0x104] ss:$16 sps:$4 sm:$0xff]   ;;  %v3038_v57 = vld [vmem:[#allocation5 + $0xe8] ss:$16 sps:$4 sm:$0xff]   ;;  %p3482_p13 = por %p3481_p12, %p3480_p11 }
  0x45   :  { %v3046_v58 = vld [vmem:[#allocation5 + $0x10c] ss:$16 sps:$4 sm:$0xff]   ;;  %v3041_v59 = vld [vmem:[#allocation5 + $0x100] ss:$16 sps:$4 sm:$0xff]   ;;  %v3049_v60 = vld [vmem:[#allocation5 + $0x124] ss:$16 sps:$4 sm:$0xff]  }
  0x46   :  { %2613 = vmatmul.mubr.msk.bf16.vlgmr.msra.gmra.mrb[0].mxu0 %vm149_vm1, %v68_v19  ;;  %2615 = vmatmul.mubr.msk.bf16.vlgmr.msra.gmra.mrb[0].mxu1 %vm149_vm1, %v68_v19  ;;  %v3044_v61 = vld [vmem:[#allocation5 + $0x108] ss:$16 sps:$4 sm:$0xff]   ;;  %v3052_v62 = vld [vmem:[#allocation5 + $0x12c] ss:$16 sps:$4 sm:$0xff]   ;;  %v3047_v63 = vld [vmem:[#allocation5 + $0x120] ss:$16 sps:$4 sm:$0xff]   ;;  %p3483_p0 = pnand %p3482_p13, %p3476_p10 }
  0x47   :  { %261 = vmatpush1.bf16.msra.mxu0 %v167_v23  ;;  %292 = vmatprep.mubr.bf16.mxu0 %v3511_v3  ;;  %v3055_v0 = vld [vmem:[#allocation5 + $0x144] ss:$16 sps:$4 sm:$0xff]   ;;  %v3050_v1 = vld [vmem:[#allocation5 + $0x128] ss:$16 sps:$4 sm:$0xff]   ;;  %v3058_v2 = vld [vmem:[#allocation5 + $0x14c] ss:$16 sps:$4 sm:$0xff]  }
  0x48   :  { %1916 = vmatprep.subr.bf16.mxu0 %v2995_v24  ;;  %302 = vmatpush1.bf16.msra.mxu1 %v173_v25  ;;  %v3061_v5 = vld [vmem:[#allocation5 + $0x164] ss:$16 sps:$4 sm:$0xff]   ;;  %v3056_v6 = vld [vmem:[#allocation5 + $0x148] ss:$16 sps:$4 sm:$0xff]   ;;  %v3064_v7 = vld [vmem:[#allocation5 + $0x16c] ss:$16 sps:$4 sm:$0xff]  }
  0x49   :  { %333 = vmatprep.mubr.bf16.mxu1 %v3511_v3  ;;  %2080 = vmatprep.subr.bf16.mxu1 %v2998_v26  ;;  %v3053_v3 = vld [vmem:[#allocation5 + $0x140] ss:$16 sps:$4 sm:$0xff]   ;;  %v3067_v9 = vld [vmem:[#allocation5 + $0x184] ss:$16 sps:$4 sm:$0xff]   ;;  %v3062_v10 = vld [vmem:[#allocation5 + $0x168] ss:$16 sps:$4 sm:$0xff]  }
  0x4a   :  { %v3059_v8 = vld [vmem:[#allocation5 + $0x160] ss:$16 sps:$4 sm:$0xff]   ;;  %v3070_v11 = vld [vmem:[#allocation5 + $0x18c] ss:$16 sps:$4 sm:$0xff]   ;;  %v3073_v13 = vld [vmem:[#allocation5 + $0x1a4] ss:$16 sps:$4 sm:$0xff]  }
  0x4b   :  { %v3065_v12 = vld [vmem:[#allocation5 + $0x180] ss:$16 sps:$4 sm:$0xff]   ;;  %v3068_v14 = vld [vmem:[#allocation5 + $0x188] ss:$16 sps:$4 sm:$0xff]   ;;  %v3076_v15 = vld [vmem:[#allocation5 + $0x1ac] ss:$16 sps:$4 sm:$0xff]  }
  0x4c   :  { %v3071_v16 = vld [vmem:[#allocation5 + $0x1a0] ss:$16 sps:$4 sm:$0xff]   ;;  %v3074_v17 = vld [vmem:[#allocation5 + $0x1a8] ss:$16 sps:$4 sm:$0xff]   ;;  %v3079_v18 = vld [vmem:[#allocation5 + $0x1c4] ss:$16 sps:$4 sm:$0xff]  }
  0x4d   :  { %v3077_v20 = vld [vmem:[#allocation5 + $0x1c0] ss:$16 sps:$4 sm:$0xff]   ;;  %v3080_v21 = vld [vmem:[#allocation5 + $0x1c8] ss:$16 sps:$4 sm:$0xff]   ;;  %v3085_v22 = vld [vmem:[#allocation5 + $0x1e4] ss:$16 sps:$4 sm:$0xff]  }
  0x4e   :  { %2617 = vmatmul.mubr.msk.bf16.vlgmr.msra.gmra.mrb[4].mxu0 %vm149_vm1, %v68_v19  ;;  %2619 = vmatmul.mubr.msk.bf16.vlgmr.msra.gmra.mrb[4].mxu1 %vm149_vm1, %v68_v19  ;;  %v3082_v19 = vld [vmem:[#allocation5 + $0x1cc] ss:$16 sps:$4 sm:$0xff]   ;;  %v3083_v24 = vld [vmem:[#allocation5 + $0x1e0] ss:$16 sps:$4 sm:$0xff]   ;;  %v3086_v25 = vld [vmem:[#allocation5 + $0x1e8] ss:$16 sps:$4 sm:$0xff]  }
  0x4f   :  { %1917 = vmatpush1.bf16.msra.mxu0 %v2993_v27  ;;  %2081 = vmatpush1.bf16.msra.mxu1 %v2996_v29  ;;  %v3088_v23 = vld [vmem:[#allocation5 + $0x1ec] ss:$16 sps:$4 sm:$0xff]   ;;  %v3091_v26 = vld [vmem:[#allocation5 + $0x204] ss:$16 sps:$4 sm:$0xff]  }
  0x50   :  { %1918 = vmatprep.subr.bf16.mxu0 %v3001_v28  ;;  %2082 = vmatprep.subr.bf16.mxu1 %v3004_v30  ;;  %v3094_v27 = vld [vmem:[#allocation5 + $0x20c] ss:$16 sps:$4 sm:$0xff]   ;;  %v75_v28 = vsub.s32 0, %v3589_v4  ;;  %v79_v30 = vsub.s32 1, %v3589_v4 }
  0x51   :  { %v3611_v29 = vld [vmem:[%s3679_s2] sm:$0xff] }
  0x53   :  { %1919 = vmatpush1.bf16.msra.mxu0 %v2999_v31  ;;  %2083 = vmatpush1.bf16.msra.mxu1 %v3002_v33  ;;  %v87_v31 = vsub.s32 3, %v3589_v4  ;;  %v80_v33 = vrot.slane %v3611_v29, %v79_v30 }
  0x54   :  { %1920 = vmatprep.subr.bf16.mxu0 %v3007_v32  ;;  %2084 = vmatprep.subr.bf16.mxu1 %v3010_v34  ;;  %v76_v32 = vrot.slane %v3611_v29, %v75_v28 }
  0x57   :  { %1921 = vmatpush1.bf16.msra.mxu0 %v3005_v35  ;;  %2085 = vmatpush1.bf16.msra.mxu1 %v3008_v37  ;;  %v88_v35 = vrot.slane %v3611_v29, %v87_v31 }
  0x58   :  { %1922 = vmatprep.subr.bf16.mxu0 %v3013_v36  ;;  %2086 = vmatprep.subr.bf16.mxu1 %v3016_v38 }
  0x5b   :  { %1923 = vmatpush1.bf16.msra.mxu0 %v3011_v39  ;;  %2087 = vmatpush1.bf16.msra.mxu1 %v3014_v41 }
  0x5c   :  { %1924 = vmatprep.subr.bf16.mxu0 %v3019_v40  ;;  %2088 = vmatprep.subr.bf16.mxu1 %v3022_v42 }
  0x5f   :  { %1925 = vmatpush1.bf16.msra.mxu0 %v3017_v43  ;;  %2089 = vmatpush1.bf16.msra.mxu1 %v3020_v45 }
  0x60   :  { %1926 = vmatprep.subr.bf16.mxu0 %v3025_v44  ;;  %2090 = vmatprep.subr.bf16.mxu1 %v3028_v46 }
  0x63   :  { %1927 = vmatpush1.bf16.msra.mxu0 %v3023_v47  ;;  %2091 = vmatpush1.bf16.msra.mxu1 %v3026_v49  ;;  %v3089_v49 = vld [vmem:[#allocation5 + $0x200] ss:$16 sps:$4 sm:$0xff]  }
  0x64   :  { %1928 = vmatprep.subr.bf16.mxu0 %v3031_v48  ;;  %2092 = vmatprep.subr.bf16.mxu1 %v3034_v51 }
  0x67   :  { %1929 = vmatpush1.bf16.msra.mxu0 %v3029_v50  ;;  %2093 = vmatpush1.bf16.msra.mxu1 %v3032_v52  ;;  %v3092_v50 = vld [vmem:[#allocation5 + $0x208] ss:$16 sps:$4 sm:$0xff]  }
  0x68   :  { %1930 = vmatprep.subr.bf16.mxu0 %v3037_v53  ;;  %2094 = vmatprep.subr.bf16.mxu1 %v3040_v54  ;;  %v3097_v53 = vld [vmem:[#allocation5 + $0x224] ss:$16 sps:$4 sm:$0xff]   ;;  %v3100_v54 = vld [vmem:[#allocation5 + $0x22c] ss:$16 sps:$4 sm:$0xff]  }
  0x6b   :  { %1931 = vmatpush1.bf16.msra.mxu0 %v3035_v55  ;;  %2095 = vmatpush1.bf16.msra.mxu1 %v3038_v57 }
  0x6c   :  { %1932 = vmatprep.subr.bf16.mxu0 %v3043_v56  ;;  %2096 = vmatprep.subr.bf16.mxu1 %v3046_v58  ;;  %v3095_v58 = vld [vmem:[#allocation5 + $0x220] ss:$16 sps:$4 sm:$0xff]  }
  0x6f   :  { %1933 = vmatpush1.bf16.msra.mxu0 %v3041_v59  ;;  %2097 = vmatpush1.bf16.msra.mxu1 %v3044_v61  ;;  %v3098_v59 = vld [vmem:[#allocation5 + $0x228] ss:$16 sps:$4 sm:$0xff]   ;;  %v3103_v61 = vld [vmem:[#allocation5 + $0x244] ss:$16 sps:$4 sm:$0xff]  }
  0x70   :  { %1934 = vmatprep.subr.bf16.mxu0 %v3049_v60  ;;  %2098 = vmatprep.subr.bf16.mxu1 %v3052_v62  ;;  %v3106_v62 = vld [vmem:[#allocation5 + $0x24c] ss:$16 sps:$4 sm:$0xff]  }
  0x73   :  { %1935 = vmatpush1.bf16.msra.mxu0 %v3047_v63  ;;  %2099 = vmatpush1.bf16.msra.mxu1 %v3050_v1  ;;  %v3104_v1 = vld [vmem:[#allocation5 + $0x248] ss:$16 sps:$4 sm:$0xff]  }
  0x74   :  { %1936 = vmatprep.subr.bf16.mxu0 %v3055_v0  ;;  %2100 = vmatprep.subr.bf16.mxu1 %v3058_v2  ;;  %v3101_v0 = vld [vmem:[#allocation5 + $0x240] ss:$16 sps:$4 sm:$0xff]   ;;  %v3109_v2 = vld [vmem:[#allocation5 + $0x264] ss:$16 sps:$4 sm:$0xff]  }
  0x77   :  { %1937 = vmatpush1.bf16.msra.mxu0 %v3053_v3  ;;  %2101 = vmatpush1.bf16.msra.mxu1 %v3056_v6  ;;  %v3112_v3 = vld [vmem:[#allocation5 + $0x26c] ss:$16 sps:$4 sm:$0xff]   ;;  %v3110_v6 = vld [vmem:[#allocation5 + $0x268] ss:$16 sps:$4 sm:$0xff]  }
  0x78   :  { %1938 = vmatprep.subr.bf16.mxu0 %v3061_v5  ;;  %2102 = vmatprep.subr.bf16.mxu1 %v3064_v7  ;;  %v3107_v5 = vld [vmem:[#allocation5 + $0x260] ss:$16 sps:$4 sm:$0xff]   ;;  %v3115_v7 = vld [vmem:[#allocation5 + $0x284] ss:$16 sps:$4 sm:$0xff]  }
  0x7b   :  { %1939 = vmatpush1.bf16.msra.mxu0 %v3059_v8  ;;  %2103 = vmatpush1.bf16.msra.mxu1 %v3062_v10  ;;  %v3118_v8 = vld [vmem:[#allocation5 + $0x28c] ss:$16 sps:$4 sm:$0xff]   ;;  %v3116_v10 = vld [vmem:[#allocation5 + $0x288] ss:$16 sps:$4 sm:$0xff]  }
  0x7c   :  { %1940 = vmatprep.subr.bf16.mxu0 %v3067_v9  ;;  %2104 = vmatprep.subr.bf16.mxu1 %v3070_v11  ;;  %v3113_v9 = vld [vmem:[#allocation5 + $0x280] ss:$16 sps:$4 sm:$0xff]   ;;  %v3121_v11 = vld [vmem:[#allocation5 + $0x2a4] ss:$16 sps:$4 sm:$0xff]  }
  0x7f   :  { %1941 = vmatpush1.bf16.msra.mxu0 %v3065_v12  ;;  %2105 = vmatpush1.bf16.msra.mxu1 %v3068_v14  ;;  %v3124_v12 = vld [vmem:[#allocation5 + $0x2ac] ss:$16 sps:$4 sm:$0xff]   ;;  %v3122_v14 = vld [vmem:[#allocation5 + $0x2a8] ss:$16 sps:$4 sm:$0xff]  }
  0x80   :  { %1942 = vmatprep.subr.bf16.mxu0 %v3073_v13  ;;  %2106 = vmatprep.subr.bf16.mxu1 %v3076_v15  ;;  %v3119_v13 = vld [vmem:[#allocation5 + $0x2a0] ss:$16 sps:$4 sm:$0xff]  }
  0x83   :  { %1943 = vmatpush1.bf16.msra.mxu0 %v3071_v16  ;;  %2107 = vmatpush1.bf16.msra.mxu1 %v3074_v17  ;;  %v3127_v16 = vld [vmem:[#allocation5 + $0x2c4] ss:$16 sps:$4 sm:$0xff]   ;;  %v3130_v17 = vld [vmem:[#allocation5 + $0x2cc] ss:$16 sps:$4 sm:$0xff]  }
  0x84   :  { %1944 = vmatprep.subr.bf16.mxu0 %v3079_v18  ;;  %2108 = vmatprep.subr.bf16.mxu1 %v3082_v19 }
  0x87   :  { %1945 = vmatpush1.bf16.msra.mxu0 %v3077_v20  ;;  %2109 = vmatpush1.bf16.msra.mxu1 %v3080_v21  ;;  %v3125_v21 = vld [vmem:[#allocation5 + $0x2c0] ss:$16 sps:$4 sm:$0xff]  }
  0x88   :  { %1946 = vmatprep.subr.bf16.mxu0 %v3085_v22  ;;  %2110 = vmatprep.subr.bf16.mxu1 %v3088_v23  ;;  %v3128_v22 = vld [vmem:[#allocation5 + $0x2c8] ss:$16 sps:$4 sm:$0xff]   ;;  %v3133_v23 = vld [vmem:[#allocation5 + $0x2e4] ss:$16 sps:$4 sm:$0xff]  }
  0x8b   :  { %1947 = vmatpush1.bf16.msra.mxu0 %v3083_v24  ;;  %2111 = vmatpush1.bf16.msra.mxu1 %v3086_v25  ;;  %v3136_v24 = vld [vmem:[#allocation5 + $0x2ec] ss:$16 sps:$4 sm:$0xff]   ;;  %v3131_v25 = vld [vmem:[#allocation5 + $0x2e0] ss:$16 sps:$4 sm:$0xff]  }
  0x8c   :  { %1957 = vmatprep.subr.bf16.mxu0 %v3091_v26  ;;  %2121 = vmatprep.subr.bf16.mxu1 %v3094_v27  ;;  %v3134_v26 = vld [vmem:[#allocation5 + $0x2e8] ss:$16 sps:$4 sm:$0xff]   ;;  %v3139_v27 = vld [vmem:[#allocation5 + $0x304] ss:$16 sps:$4 sm:$0xff]  }
 0x119   :  { %v212_v34 = vpop.f32.mrb[0].mxu0  ;;  %v3624_v40 = vpop.f32.mrb[0].mxu1 }
 0x11a   :  { %v213_v36 = vadd.f32 %v212_v34, %v76_v32  ;;  %v214_v37 = vpop.f32.mrb[1].mxu0  ;;  %v255_v43 = vpop.f32.mrb[1].mxu1  ;;  %v3142_v32 = vld [vmem:[#allocation5 + $0x30c] ss:$16 sps:$4 sm:$0xff]   ;;  %v3140_v34 = vld [vmem:[#allocation5 + $0x308] ss:$16 sps:$4 sm:$0xff]  }
 0x11b   :  { %v215_v38 = vadd.f32 %v214_v37, %v80_v33  ;;  %v216_v39 = vpop.f32.mrb[2].mxu0  ;;  %v256_v45 = vadd.f32 %v255_v43, %v88_v35  ;;  %v257_v46 = vpop.f32.mrb[2].mxu1  ;;  %v3137_v33 = vld [vmem:[#allocation5 + $0x300] ss:$16 sps:$4 sm:$0xff]   ;;  %v3145_v35 = vld [vmem:[#allocation5 + $0x324] ss:$16 sps:$4 sm:$0xff]  }
 0x11c   :  { %v342_v41 = vmax.f32 %v213_v36, 0.0  ;;  %v217_v42 = vpop.f32.mrb[3].mxu0  ;;  %v258_v47 = vpop.f32.mrb[3].mxu1  ;;  %v3148_v36 = vld [vmem:[#allocation5 + $0x32c] ss:$16 sps:$4 sm:$0xff]  }
 0x11d   :  { %v343_v44 = vmax.f32 %v215_v38, 0.0  ;;  %v345_v51 = vmax.f32 %v256_v45, 0.0  ;;  %v3143_v37 = vld [vmem:[#allocation5 + $0x320] ss:$16 sps:$4 sm:$0xff]   ;;  %v3146_v38 = vld [vmem:[#allocation5 + $0x328] ss:$16 sps:$4 sm:$0xff]  }
 0x11e   :  { %v350_v52 = vpack.c.bf16 %v342_v41, %v342_v41  ;;  %v3151_v39 = vld [vmem:[#allocation5 + $0x344] ss:$16 sps:$4 sm:$0xff]   ;;  %v3154_v41 = vld [vmem:[#allocation5 + $0x34c] ss:$16 sps:$4 sm:$0xff]   ;;  %v3149_v42 = vld [vmem:[#allocation5 + $0x340] ss:$16 sps:$4 sm:$0xff]  }
 0x11f   :  { %v351_v48 = vpack.c.bf16 %v343_v44, %v343_v44  ;;  %v353_v55 = vpack.c.bf16 %v345_v51, %v345_v51  ;;  %v3152_v43 = vld [vmem:[#allocation5 + $0x348] ss:$16 sps:$4 sm:$0xff]   ;;  %v3157_v44 = vld [vmem:[#allocation5 + $0x364] ss:$16 sps:$4 sm:$0xff]   ;;  %v3160_v45 = vld [vmem:[#allocation5 + $0x36c] ss:$16 sps:$4 sm:$0xff]  }
 0x120   :  { %v3155_v46 = vld [vmem:[#allocation5 + $0x360] ss:$16 sps:$4 sm:$0xff]   ;;  %v3158_v47 = vld [vmem:[#allocation5 + $0x368] ss:$16 sps:$4 sm:$0xff]  }
 0x121   :  { %1948 = vmatprep.mubr.bf16.mxu0 %v351_v48  ;;  %2112 = vmatprep.mubr.bf16.mxu1 %v351_v48  ;;  %v3626_v56 = vpop.f32.mrb[4].mxu0  ;;  %v3630_v15 = vpop.f32.mrb[4].mxu1  ;;  %v3163_v48 = vld [vmem:[#allocation5 + $0x384] ss:$16 sps:$4 sm:$0xff]   ;;  %v3161_v51 = vld [vmem:[#allocation5 + $0x380] ss:$16 sps:$4 sm:$0xff]  }
 0x122   :  { %1949 = vmatmul.mubr.bf16.vlgmr.msra.gmra.mrb[8].mxu0 %v350_v52  ;;  %2113 = vmatmul.mubr.bf16.vlgmr.msra.gmra.mrb[8].mxu1 %v350_v52  ;;  %v3628_v57 = vpop.f32.mrb[5].mxu0  ;;  %v3632_v18 = vpop.f32.mrb[5].mxu1  ;;  %v3164_v52 = vld [vmem:[#allocation5 + $0x388] ss:$16 sps:$4 sm:$0xff]  }
 0x123   :  { %1958 = vmatpush1.bf16.msra.mxu0 %v3089_v49  ;;  %2122 = vmatpush1.bf16.msra.mxu1 %v3092_v50  ;;  %v298_v60 = vpop.f32.mrb[6].mxu0  ;;  %v339_v19 = vpop.f32.mrb[6].mxu1  ;;  %v3166_v49 = vld [vmem:[#allocation5 + $0x38c] ss:$16 sps:$4 sm:$0xff]   ;;  %v83_v50 = vsub.s32 2, %v3589_v4 }
 0x124   :  { %1959 = vmatprep.subr.bf16.mxu0 %v3097_v53  ;;  %2123 = vmatprep.subr.bf16.mxu1 %v3100_v54  ;;  %v299_v63 = vpop.f32.mrb[7].mxu0  ;;  %v340_v20 = vpop.f32.mrb[7].mxu1  ;;  %v3169_v53 = vld [vmem:[#allocation5 + $0x3a4] ss:$16 sps:$4 sm:$0xff]   ;;  %v3172_v54 = vld [vmem:[#allocation5 + $0x3ac] ss:$16 sps:$4 sm:$0xff]  }
 0x125   :  { %1989 = vmatprep.mubr.bf16.mxu0 %v353_v55  ;;  %2153 = vmatprep.mubr.bf16.mxu1 %v353_v55  ;;  %v95_v55 = vsub.s32 5, %v3589_v4  ;;  %v3170_v60 = vld [vmem:[#allocation5 + $0x3a8] ss:$16 sps:$4 sm:$0xff]   ;;  %v3191_v19 = vld [vmem:[#allocation5 + $0x420] ss:$16 sps:$4 sm:$0xff]  }
 0x126   :  { %v3194_v20 = vld [vmem:[#allocation5 + $0x428] ss:$16 sps:$4 sm:$0xff]  }
 0x127   :  { %1960 = vmatpush1.bf16.msra.mxu0 %v3095_v58  ;;  %2124 = vmatpush1.bf16.msra.mxu1 %v3098_v59  ;;  %v84_v58 = vrot.slane %v3611_v29, %v83_v50  ;;  %v3167_v59 = vld [vmem:[#allocation5 + $0x3a0] ss:$16 sps:$4 sm:$0xff]   ;;  %v96_v63 = vrot.slane %v3611_v29, %v95_v55  ;;  %v3241_v55 = vld [vmem:[#allocation5 + $0x524] ss:$16 sps:$4 sm:$0xff]  }
 0x128   :  { %1961 = vmatprep.subr.bf16.mxu0 %v3103_v61  ;;  %2125 = vmatprep.subr.bf16.mxu1 %v3106_v62  ;;  %v3175_v61 = vld [vmem:[#allocation5 + $0x3c4] ss:$16 sps:$4 sm:$0xff]   ;;  %v3178_v62 = vld [vmem:[#allocation5 + $0x3cc] ss:$16 sps:$4 sm:$0xff]  }
 0x12b   :  { %1962 = vmatpush1.bf16.msra.mxu0 %v3101_v0  ;;  %2126 = vmatpush1.bf16.msra.mxu1 %v3104_v1  ;;  %v254_v0 = vadd.f32 %v3624_v40, %v84_v58  ;;  %v3173_v1 = vld [vmem:[#allocation5 + $0x3c0] ss:$16 sps:$4 sm:$0xff]   ;;  %v3244_v58 = vld [vmem:[#allocation5 + $0x52c] ss:$16 sps:$4 sm:$0xff]  }
 0x12c   :  { %1963 = vmatprep.subr.bf16.mxu0 %v3109_v2  ;;  %2127 = vmatprep.subr.bf16.mxu1 %v3112_v3  ;;  %v3176_v2 = vld [vmem:[#allocation5 + $0x3c8] ss:$16 sps:$4 sm:$0xff]   ;;  %v3181_v3 = vld [vmem:[#allocation5 + $0x3e4] ss:$16 sps:$4 sm:$0xff]  }
 0x12f   :  { %1964 = vmatpush1.bf16.msra.mxu0 %v3107_v5  ;;  %2128 = vmatpush1.bf16.msra.mxu1 %v3110_v6  ;;  %v3184_v5 = vld [vmem:[#allocation5 + $0x3ec] ss:$16 sps:$4 sm:$0xff]   ;;  %v297_v6 = vadd.f32 %v3628_v57, %v96_v63  ;;  %v3245_v63 = vld [vmem:[#allocation5 + $0x540] ss:$16 sps:$4 sm:$0xff]  }
 0x130   :  { %1965 = vmatprep.subr.bf16.mxu0 %v3115_v7  ;;  %2129 = vmatprep.subr.bf16.mxu1 %v3118_v8  ;;  %v344_v7 = vmax.f32 %v254_v0, 0.0  ;;  %v3179_v8 = vld [vmem:[#allocation5 + $0x3e0] ss:$16 sps:$4 sm:$0xff]   ;;  %v3248_v0 = vld [vmem:[#allocation5 + $0x548] ss:$16 sps:$4 sm:$0xff]  }
 0x131   :  { %v347_v40 = vmax.f32 %v297_v6, 0.0  ;;  %v3259_v6 = vld [vmem:[#allocation5 + $0x584] ss:$16 sps:$4 sm:$0xff]  }
 0x133   :  { %1966 = vmatpush1.bf16.msra.mxu0 %v3113_v9  ;;  %2130 = vmatpush1.bf16.msra.mxu1 %v3116_v10  ;;  %v3182_v9 = vld [vmem:[#allocation5 + $0x3e8] ss:$16 sps:$4 sm:$0xff]   ;;  %v3187_v10 = vld [vmem:[#allocation5 + $0x404] ss:$16 sps:$4 sm:$0xff]   ;;  %v355_v57 = vpack.c.bf16 %v347_v40, %v347_v40  ;;  %v3268_v40 = vld [vmem:[#allocation5 + $0x5ac] ss:$16 sps:$4 sm:$0xff]  }
 0x134   :  { %1967 = vmatprep.subr.bf16.mxu0 %v3121_v11  ;;  %2131 = vmatprep.subr.bf16.mxu1 %v3124_v12  ;;  %v3190_v11 = vld [vmem:[#allocation5 + $0x40c] ss:$16 sps:$4 sm:$0xff]   ;;  %v352_v12 = vpack.c.bf16 %v344_v7, %v344_v7 }
 0x135   :  { %v3262_v7 = vld [vmem:[#allocation5 + $0x58c] ss:$16 sps:$4 sm:$0xff]  }
 0x137   :  { %1968 = vmatpush1.bf16.msra.mxu0 %v3119_v13  ;;  %2132 = vmatpush1.bf16.msra.mxu1 %v3122_v14  ;;  %v3185_v13 = vld [vmem:[#allocation5 + $0x400] ss:$16 sps:$4 sm:$0xff]   ;;  %v3188_v14 = vld [vmem:[#allocation5 + $0x408] ss:$16 sps:$4 sm:$0xff]  }
 0x138   :  { %1969 = vmatprep.subr.bf16.mxu0 %v3127_v16  ;;  %2133 = vmatprep.subr.bf16.mxu1 %v3130_v17  ;;  %v3193_v16 = vld [vmem:[#allocation5 + $0x424] ss:$16 sps:$4 sm:$0xff]   ;;  %v3196_v17 = vld [vmem:[#allocation5 + $0x42c] ss:$16 sps:$4 sm:$0xff]  }
 0x13b   :  { %1970 = vmatpush1.bf16.msra.mxu0 %v3125_v21  ;;  %2134 = vmatpush1.bf16.msra.mxu1 %v3128_v22  ;;  %v3199_v21 = vld [vmem:[#allocation5 + $0x444] ss:$16 sps:$4 sm:$0xff]   ;;  %v3202_v22 = vld [vmem:[#allocation5 + $0x44c] ss:$16 sps:$4 sm:$0xff]  }
 0x13c   :  { %1971 = vmatprep.subr.bf16.mxu0 %v3133_v23  ;;  %2135 = vmatprep.subr.bf16.mxu1 %v3136_v24  ;;  %v3197_v23 = vld [vmem:[#allocation5 + $0x440] ss:$16 sps:$4 sm:$0xff]   ;;  %v3200_v24 = vld [vmem:[#allocation5 + $0x448] ss:$16 sps:$4 sm:$0xff]  }
 0x13f   :  { %1972 = vmatpush1.bf16.msra.mxu0 %v3131_v25  ;;  %2136 = vmatpush1.bf16.msra.mxu1 %v3134_v26  ;;  %v3205_v25 = vld [vmem:[#allocation5 + $0x464] ss:$16 sps:$4 sm:$0xff]   ;;  %v3208_v26 = vld [vmem:[#allocation5 + $0x46c] ss:$16 sps:$4 sm:$0xff]  }
 0x140   :  { %1973 = vmatprep.subr.bf16.mxu0 %v3139_v27  ;;  %2137 = vmatprep.subr.bf16.mxu1 %v3142_v32  ;;  %v3203_v27 = vld [vmem:[#allocation5 + $0x460] ss:$16 sps:$4 sm:$0xff]   ;;  %v3206_v32 = vld [vmem:[#allocation5 + $0x468] ss:$16 sps:$4 sm:$0xff]  }
 0x143   :  { %1974 = vmatpush1.bf16.msra.mxu0 %v3137_v33  ;;  %2138 = vmatpush1.bf16.msra.mxu1 %v3140_v34  ;;  %v3211_v33 = vld [vmem:[#allocation5 + $0x484] ss:$16 sps:$4 sm:$0xff]   ;;  %v3214_v34 = vld [vmem:[#allocation5 + $0x48c] ss:$16 sps:$4 sm:$0xff]  }
 0x144   :  { %1975 = vmatprep.subr.bf16.mxu0 %v3145_v35  ;;  %2139 = vmatprep.subr.bf16.mxu1 %v3148_v36  ;;  %v3209_v35 = vld [vmem:[#allocation5 + $0x480] ss:$16 sps:$4 sm:$0xff]   ;;  %v3212_v36 = vld [vmem:[#allocation5 + $0x488] ss:$16 sps:$4 sm:$0xff]  }
 0x147   :  { %1976 = vmatpush1.bf16.msra.mxu0 %v3143_v37  ;;  %2140 = vmatpush1.bf16.msra.mxu1 %v3146_v38  ;;  %v3217_v37 = vld [vmem:[#allocation5 + $0x4a4] ss:$16 sps:$4 sm:$0xff]   ;;  %v3220_v38 = vld [vmem:[#allocation5 + $0x4ac] ss:$16 sps:$4 sm:$0xff]  }
 0x148   :  { %1977 = vmatprep.subr.bf16.mxu0 %v3151_v39  ;;  %2141 = vmatprep.subr.bf16.mxu1 %v3154_v41  ;;  %v3215_v39 = vld [vmem:[#allocation5 + $0x4a0] ss:$16 sps:$4 sm:$0xff]   ;;  %v3218_v41 = vld [vmem:[#allocation5 + $0x4a8] ss:$16 sps:$4 sm:$0xff]  }
 0x14b   :  { %1978 = vmatpush1.bf16.msra.mxu0 %v3149_v42  ;;  %2142 = vmatpush1.bf16.msra.mxu1 %v3152_v43  ;;  %v3223_v42 = vld [vmem:[#allocation5 + $0x4c4] ss:$16 sps:$4 sm:$0xff]   ;;  %v3226_v43 = vld [vmem:[#allocation5 + $0x4cc] ss:$16 sps:$4 sm:$0xff]  }
 0x14c   :  { %1979 = vmatprep.subr.bf16.mxu0 %v3157_v44  ;;  %2143 = vmatprep.subr.bf16.mxu1 %v3160_v45  ;;  %v3221_v44 = vld [vmem:[#allocation5 + $0x4c0] ss:$16 sps:$4 sm:$0xff]   ;;  %v3224_v45 = vld [vmem:[#allocation5 + $0x4c8] ss:$16 sps:$4 sm:$0xff]  }
 0x14f   :  { %1980 = vmatpush1.bf16.msra.mxu0 %v3155_v46  ;;  %2144 = vmatpush1.bf16.msra.mxu1 %v3158_v47  ;;  %v3229_v46 = vld [vmem:[#allocation5 + $0x4e4] ss:$16 sps:$4 sm:$0xff]   ;;  %v3232_v47 = vld [vmem:[#allocation5 + $0x4ec] ss:$16 sps:$4 sm:$0xff]  }
 0x150   :  { %1981 = vmatprep.subr.bf16.mxu0 %v3163_v48  ;;  %2145 = vmatprep.subr.bf16.mxu1 %v3166_v49  ;;  %v3227_v48 = vld [vmem:[#allocation5 + $0x4e0] ss:$16 sps:$4 sm:$0xff]   ;;  %v3230_v49 = vld [vmem:[#allocation5 + $0x4e8] ss:$16 sps:$4 sm:$0xff]  }
 0x153   :  { %1982 = vmatpush1.bf16.msra.mxu0 %v3161_v51  ;;  %2146 = vmatpush1.bf16.msra.mxu1 %v3164_v52  ;;  %v3235_v51 = vld [vmem:[#allocation5 + $0x504] ss:$16 sps:$4 sm:$0xff]   ;;  %v3238_v52 = vld [vmem:[#allocation5 + $0x50c] ss:$16 sps:$4 sm:$0xff]  }
 0x154   :  { %1983 = vmatprep.subr.bf16.mxu0 %v3169_v53  ;;  %2147 = vmatprep.subr.bf16.mxu1 %v3172_v54  ;;  %v3233_v53 = vld [vmem:[#allocation5 + $0x500] ss:$16 sps:$4 sm:$0xff]   ;;  %v3236_v54 = vld [vmem:[#allocation5 + $0x508] ss:$16 sps:$4 sm:$0xff]  }
 0x157   :  { %1984 = vmatpush1.bf16.msra.mxu0 %v3167_v59  ;;  %2148 = vmatpush1.bf16.msra.mxu1 %v3170_v60  ;;  %v3239_v59 = vld [vmem:[#allocation5 + $0x520] ss:$16 sps:$4 sm:$0xff]   ;;  %v3242_v60 = vld [vmem:[#allocation5 + $0x528] ss:$16 sps:$4 sm:$0xff]  }
 0x158   :  { %1985 = vmatprep.subr.bf16.mxu0 %v3175_v61  ;;  %2149 = vmatprep.subr.bf16.mxu1 %v3178_v62  ;;  %v3247_v61 = vld [vmem:[#allocation5 + $0x544] ss:$16 sps:$4 sm:$0xff]   ;;  %v3250_v62 = vld [vmem:[#allocation5 + $0x54c] ss:$16 sps:$4 sm:$0xff]  }
 0x15b   :  { %1986 = vmatpush1.bf16.msra.mxu0 %v3173_v1  ;;  %2150 = vmatpush1.bf16.msra.mxu1 %v3176_v2  ;;  %v3253_v1 = vld [vmem:[#allocation5 + $0x564] ss:$16 sps:$4 sm:$0xff]   ;;  %v3256_v2 = vld [vmem:[#allocation5 + $0x56c] ss:$16 sps:$4 sm:$0xff]  }
 0x15c   :  { %1987 = vmatprep.subr.bf16.mxu0 %v3181_v3  ;;  %2151 = vmatprep.subr.bf16.mxu1 %v3184_v5  ;;  %v3251_v3 = vld [vmem:[#allocation5 + $0x560] ss:$16 sps:$4 sm:$0xff]   ;;  %v3254_v5 = vld [vmem:[#allocation5 + $0x568] ss:$16 sps:$4 sm:$0xff]  }
 0x15f   :  { %1988 = vmatpush1.bf16.msra.mxu0 %v3179_v8  ;;  %2152 = vmatpush1.bf16.msra.mxu1 %v3182_v9  ;;  %v91_v8 = vsub.s32 4, %v3589_v4  ;;  %v3257_v9 = vld [vmem:[#allocation5 + $0x580] ss:$16 sps:$4 sm:$0xff]  }
 0x160   :  { %1998 = vmatprep.subr.bf16.mxu0 %v3187_v10  ;;  %2162 = vmatprep.subr.bf16.mxu1 %v3190_v11  ;;  %v3260_v10 = vld [vmem:[#allocation5 + $0x588] ss:$16 sps:$4 sm:$0xff]   ;;  %v3265_v11 = vld [vmem:[#allocation5 + $0x5a4] ss:$16 sps:$4 sm:$0xff]  }
 0x162   :  { %1990 = vmatmul.mubr.bf16.vlgmr.msra.gmra.mrb[8].mxu0 %v352_v12  ;;  %2154 = vmatmul.mubr.bf16.vlgmr.msra.gmra.mrb[8].mxu1 %v352_v12  ;;  %v103_v12 = vsub.s32 7, %v3589_v4 }
 0x163   :  { %1999 = vmatpush1.bf16.msra.mxu0 %v3185_v13  ;;  %2163 = vmatpush1.bf16.msra.mxu1 %v3188_v14  ;;  %v92_v13 = vrot.slane %v3611_v29, %v91_v8  ;;  %v3263_v14 = vld [vmem:[#allocation5 + $0x5a0] ss:$16 sps:$4 sm:$0xff]   ;;  %v3334_v8 = vld [vmem:[#allocation5 + $0x70c] ss:$16 sps:$4 sm:$0xff]  }
 0x164   :  { %2000 = vmatprep.subr.bf16.mxu0 %v3193_v16  ;;  %2164 = vmatprep.subr.bf16.mxu1 %v3196_v17  ;;  %v3266_v16 = vld [vmem:[#allocation5 + $0x5a8] ss:$16 sps:$4 sm:$0xff]   ;;  %v3271_v17 = vld [vmem:[#allocation5 + $0x5c4] ss:$16 sps:$4 sm:$0xff]  }
 0x165   :  { %2030 = vmatprep.mubr.bf16.mxu0 %v355_v57  ;;  %2194 = vmatprep.mubr.bf16.mxu1 %v355_v57  ;;  %v3274_v57 = vld [vmem:[#allocation5 + $0x5cc] ss:$16 sps:$4 sm:$0xff]  }
 0x167   :  { %2001 = vmatpush1.bf16.msra.mxu0 %v3191_v19  ;;  %2165 = vmatpush1.bf16.msra.mxu1 %v3194_v20  ;;  %v104_v19 = vrot.slane %v3611_v29, %v103_v12  ;;  %v295_v20 = vadd.f32 %v3626_v56, %v92_v13  ;;  %v3335_v12 = vld [vmem:[#allocation5 + $0x720] ss:$16 sps:$4 sm:$0xff]   ;;  %v3338_v13 = vld [vmem:[#allocation5 + $0x728] ss:$16 sps:$4 sm:$0xff]  }
 0x168   :  { %2002 = vmatprep.subr.bf16.mxu0 %v3199_v21  ;;  %2166 = vmatprep.subr.bf16.mxu1 %v3202_v22  ;;  %v3269_v21 = vld [vmem:[#allocation5 + $0x5c0] ss:$16 sps:$4 sm:$0xff]   ;;  %v3272_v22 = vld [vmem:[#allocation5 + $0x5c8] ss:$16 sps:$4 sm:$0xff]  }
 0x16b   :  { %2003 = vmatpush1.bf16.msra.mxu0 %v3197_v23  ;;  %2167 = vmatpush1.bf16.msra.mxu1 %v3200_v24  ;;  %v3277_v23 = vld [vmem:[#allocation5 + $0x5e4] ss:$16 sps:$4 sm:$0xff]   ;;  %v3280_v24 = vld [vmem:[#allocation5 + $0x5ec] ss:$16 sps:$4 sm:$0xff]  }
 0x16c   :  { %2004 = vmatprep.subr.bf16.mxu0 %v3205_v25  ;;  %2168 = vmatprep.subr.bf16.mxu1 %v3208_v26  ;;  %v338_v25 = vadd.f32 %v3632_v18, %v104_v19  ;;  %v346_v26 = vmax.f32 %v295_v20, 0.0  ;;  %v3349_v19 = vld [vmem:[#allocation5 + $0x764] ss:$16 sps:$4 sm:$0xff]   ;;  %v3352_v20 = vld [vmem:[#allocation5 + $0x76c] ss:$16 sps:$4 sm:$0xff]  }
 0x16e   :  { %v349_v56 = vmax.f32 %v338_v25, 0.0  ;;  %v3353_v25 = vld [vmem:[#allocation5 + $0x780] ss:$16 sps:$4 sm:$0xff]  }
 0x16f   :  { %2005 = vmatpush1.bf16.msra.mxu0 %v3203_v27  ;;  %2169 = vmatpush1.bf16.msra.mxu1 %v3206_v32  ;;  %v3275_v27 = vld [vmem:[#allocation5 + $0x5e0] ss:$16 sps:$4 sm:$0xff]   ;;  %v3278_v32 = vld [vmem:[#allocation5 + $0x5e8] ss:$16 sps:$4 sm:$0xff]  }
 0x170   :  { %2006 = vmatprep.subr.bf16.mxu0 %v3211_v33  ;;  %2170 = vmatprep.subr.bf16.mxu1 %v3214_v34  ;;  %v3283_v33 = vld [vmem:[#allocation5 + $0x604] ss:$16 sps:$4 sm:$0xff]   ;;  %v3286_v34 = vld [vmem:[#allocation5 + $0x60c] ss:$16 sps:$4 sm:$0xff]   ;;  %v357_v18 = vpack.c.bf16 %v349_v56, %v349_v56  ;;  %v3362_v56 = vld [vmem:[#allocation5 + $0x7a8] ss:$16 sps:$4 sm:$0xff]  }
 0x173   :  { %2007 = vmatpush1.bf16.msra.mxu0 %v3209_v35  ;;  %2171 = vmatpush1.bf16.msra.mxu1 %v3212_v36  ;;  %v354_v35 = vpack.c.bf16 %v346_v26, %v346_v26  ;;  %v3281_v36 = vld [vmem:[#allocation5 + $0x600] ss:$16 sps:$4 sm:$0xff]   ;;  %v3356_v26 = vld [vmem:[#allocation5 + $0x788] ss:$16 sps:$4 sm:$0xff]  }
 0x174   :  { %2008 = vmatprep.subr.bf16.mxu0 %v3217_v37  ;;  %2172 = vmatprep.subr.bf16.mxu1 %v3220_v38  ;;  %v3284_v37 = vld [vmem:[#allocation5 + $0x608] ss:$16 sps:$4 sm:$0xff]   ;;  %v3289_v38 = vld [vmem:[#allocation5 + $0x624] ss:$16 sps:$4 sm:$0xff]  }
 0x177   :  { %2009 = vmatpush1.bf16.msra.mxu0 %v3215_v39  ;;  %2173 = vmatpush1.bf16.msra.mxu1 %v3218_v41  ;;  %v3292_v39 = vld [vmem:[#allocation5 + $0x62c] ss:$16 sps:$4 sm:$0xff]   ;;  %v3287_v41 = vld [vmem:[#allocation5 + $0x620] ss:$16 sps:$4 sm:$0xff]  }
 0x178   :  { %2010 = vmatprep.subr.bf16.mxu0 %v3223_v42  ;;  %2174 = vmatprep.subr.bf16.mxu1 %v3226_v43  ;;  %v3290_v42 = vld [vmem:[#allocation5 + $0x628] ss:$16 sps:$4 sm:$0xff]   ;;  %v3295_v43 = vld [vmem:[#allocation5 + $0x644] ss:$16 sps:$4 sm:$0xff]  }
 0x17b   :  { %2011 = vmatpush1.bf16.msra.mxu0 %v3221_v44  ;;  %2175 = vmatpush1.bf16.msra.mxu1 %v3224_v45  ;;  %v3298_v44 = vld [vmem:[#allocation5 + $0x64c] ss:$16 sps:$4 sm:$0xff]   ;;  %v3293_v45 = vld [vmem:[#allocation5 + $0x640] ss:$16 sps:$4 sm:$0xff]  }
 0x17c   :  { %2012 = vmatprep.subr.bf16.mxu0 %v3229_v46  ;;  %2176 = vmatprep.subr.bf16.mxu1 %v3232_v47  ;;  %v3296_v46 = vld [vmem:[#allocation5 + $0x648] ss:$16 sps:$4 sm:$0xff]   ;;  %v3301_v47 = vld [vmem:[#allocation5 + $0x664] ss:$16 sps:$4 sm:$0xff]  }
 0x17f   :  { %2013 = vmatpush1.bf16.msra.mxu0 %v3227_v48  ;;  %2177 = vmatpush1.bf16.msra.mxu1 %v3230_v49  ;;  %v3304_v48 = vld [vmem:[#allocation5 + $0x66c] ss:$16 sps:$4 sm:$0xff]   ;;  %v3299_v49 = vld [vmem:[#allocation5 + $0x660] ss:$16 sps:$4 sm:$0xff]  }
 0x180   :  { %2014 = vmatprep.subr.bf16.mxu0 %v3235_v51  ;;  %2178 = vmatprep.subr.bf16.mxu1 %v3238_v52  ;;  %v3302_v51 = vld [vmem:[#allocation5 + $0x668] ss:$16 sps:$4 sm:$0xff]   ;;  %v3307_v52 = vld [vmem:[#allocation5 + $0x684] ss:$16 sps:$4 sm:$0xff]  }
 0x183   :  { %2015 = vmatpush1.bf16.msra.mxu0 %v3233_v53  ;;  %2179 = vmatpush1.bf16.msra.mxu1 %v3236_v54  ;;  %v3310_v53 = vld [vmem:[#allocation5 + $0x68c] ss:$16 sps:$4 sm:$0xff]   ;;  %v3305_v54 = vld [vmem:[#allocation5 + $0x680] ss:$16 sps:$4 sm:$0xff]  }
 0x184   :  { %2016 = vmatprep.subr.bf16.mxu0 %v3241_v55  ;;  %2180 = vmatprep.subr.bf16.mxu1 %v3244_v58  ;;  %v3308_v55 = vld [vmem:[#allocation5 + $0x688] ss:$16 sps:$4 sm:$0xff]   ;;  %v3313_v58 = vld [vmem:[#allocation5 + $0x6a4] ss:$16 sps:$4 sm:$0xff]  }
 0x187   :  { %2017 = vmatpush1.bf16.msra.mxu0 %v3239_v59  ;;  %2181 = vmatpush1.bf16.msra.mxu1 %v3242_v60  ;;  %v3316_v59 = vld [vmem:[#allocation5 + $0x6ac] ss:$16 sps:$4 sm:$0xff]   ;;  %v3311_v60 = vld [vmem:[#allocation5 + $0x6a0] ss:$16 sps:$4 sm:$0xff]  }
 0x188   :  { %2018 = vmatprep.subr.bf16.mxu0 %v3247_v61  ;;  %2182 = vmatprep.subr.bf16.mxu1 %v3250_v62  ;;  %v3314_v61 = vld [vmem:[#allocation5 + $0x6a8] ss:$16 sps:$4 sm:$0xff]   ;;  %v3319_v62 = vld [vmem:[#allocation5 + $0x6c4] ss:$16 sps:$4 sm:$0xff]  }
 0x18b   :  { %2019 = vmatpush1.bf16.msra.mxu0 %v3245_v63  ;;  %2183 = vmatpush1.bf16.msra.mxu1 %v3248_v0  ;;  %v3322_v63 = vld [vmem:[#allocation5 + $0x6cc] ss:$16 sps:$4 sm:$0xff]   ;;  %v3317_v0 = vld [vmem:[#allocation5 + $0x6c0] ss:$16 sps:$4 sm:$0xff]  }
 0x18c   :  { %2020 = vmatprep.subr.bf16.mxu0 %v3253_v1  ;;  %2184 = vmatprep.subr.bf16.mxu1 %v3256_v2  ;;  %v3320_v1 = vld [vmem:[#allocation5 + $0x6c8] ss:$16 sps:$4 sm:$0xff]   ;;  %v3325_v2 = vld [vmem:[#allocation5 + $0x6e4] ss:$16 sps:$4 sm:$0xff]  }
 0x18f   :  { %2021 = vmatpush1.bf16.msra.mxu0 %v3251_v3  ;;  %2185 = vmatpush1.bf16.msra.mxu1 %v3254_v5  ;;  %v3328_v3 = vld [vmem:[#allocation5 + $0x6ec] ss:$16 sps:$4 sm:$0xff]   ;;  %v3323_v5 = vld [vmem:[#allocation5 + $0x6e0] ss:$16 sps:$4 sm:$0xff]  }
 0x190   :  { %2022 = vmatprep.subr.bf16.mxu0 %v3259_v6  ;;  %2186 = vmatprep.subr.bf16.mxu1 %v3262_v7  ;;  %v3326_v6 = vld [vmem:[#allocation5 + $0x6e8] ss:$16 sps:$4 sm:$0xff]   ;;  %v3331_v7 = vld [vmem:[#allocation5 + $0x704] ss:$16 sps:$4 sm:$0xff]  }
 0x193   :  { %2023 = vmatpush1.bf16.msra.mxu0 %v3257_v9  ;;  %2187 = vmatpush1.bf16.msra.mxu1 %v3260_v10  ;;  %v3329_v9 = vld [vmem:[#allocation5 + $0x700] ss:$16 sps:$4 sm:$0xff]   ;;  %v3332_v10 = vld [vmem:[#allocation5 + $0x708] ss:$16 sps:$4 sm:$0xff]  }
 0x194   :  { %2024 = vmatprep.subr.bf16.mxu0 %v3265_v11  ;;  %2188 = vmatprep.subr.bf16.mxu1 %v3268_v40  ;;  %v3337_v11 = vld [vmem:[#allocation5 + $0x724] ss:$16 sps:$4 sm:$0xff]   ;;  %v3340_v40 = vld [vmem:[#allocation5 + $0x72c] ss:$16 sps:$4 sm:$0xff]  }
 0x197   :  { %2025 = vmatpush1.bf16.msra.mxu0 %v3263_v14  ;;  %2189 = vmatpush1.bf16.msra.mxu1 %v3266_v16  ;;  %v3343_v14 = vld [vmem:[#allocation5 + $0x744] ss:$16 sps:$4 sm:$0xff]   ;;  %v3346_v16 = vld [vmem:[#allocation5 + $0x74c] ss:$16 sps:$4 sm:$0xff]  }
 0x198   :  { %2026 = vmatprep.subr.bf16.mxu0 %v3271_v17  ;;  %2190 = vmatprep.subr.bf16.mxu1 %v3274_v57  ;;  %v3341_v17 = vld [vmem:[#allocation5 + $0x740] ss:$16 sps:$4 sm:$0xff]   ;;  %v3344_v57 = vld [vmem:[#allocation5 + $0x748] ss:$16 sps:$4 sm:$0xff]  }
 0x19b   :  { %2027 = vmatpush1.bf16.msra.mxu0 %v3269_v21  ;;  %2191 = vmatpush1.bf16.msra.mxu1 %v3272_v22  ;;  %v3347_v21 = vld [vmem:[#allocation5 + $0x760] ss:$16 sps:$4 sm:$0xff]   ;;  %v3350_v22 = vld [vmem:[#allocation5 + $0x768] ss:$16 sps:$4 sm:$0xff]  }
 0x19c   :  { %2028 = vmatprep.subr.bf16.mxu0 %v3277_v23  ;;  %2192 = vmatprep.subr.bf16.mxu1 %v3280_v24  ;;  %v3355_v23 = vld [vmem:[#allocation5 + $0x784] ss:$16 sps:$4 sm:$0xff]   ;;  %v3358_v24 = vld [vmem:[#allocation5 + $0x78c] ss:$16 sps:$4 sm:$0xff]  }
 0x19f   :  { %2029 = vmatpush1.bf16.msra.mxu0 %v3275_v27  ;;  %2193 = vmatpush1.bf16.msra.mxu1 %v3278_v32  ;;  %v99_v27 = vsub.s32 6, %v3589_v4  ;;  %v3361_v32 = vld [vmem:[#allocation5 + $0x7a4] ss:$16 sps:$4 sm:$0xff]  }
 0x1a0   :  { %2039 = vmatprep.subr.bf16.mxu0 %v3283_v33  ;;  %2203 = vmatprep.subr.bf16.mxu1 %v3286_v34  ;;  %v3364_v33 = vld [vmem:[#allocation5 + $0x7ac] ss:$16 sps:$4 sm:$0xff]   ;;  %v3359_v34 = vld [vmem:[#allocation5 + $0x7a0] ss:$16 sps:$4 sm:$0xff]  }
 0x1a2   :  { %2031 = vmatmul.mubr.bf16.vlgmr.msra.gmra.mrb[8].mxu0 %v354_v35  ;;  %2195 = vmatmul.mubr.bf16.vlgmr.msra.gmra.mrb[8].mxu1 %v354_v35  ;;  %v100_v35 = vrot.slane %v3611_v29, %v99_v27  ;;  %v3377_v29 = vld [vmem:[#allocation7 + $0x40] sm:$0xff]  }
 0x1a3   :  { %2040 = vmatpush1.bf16.msra.mxu0 %v3281_v36  ;;  %2204 = vmatpush1.bf16.msra.mxu1 %v3284_v37  ;;  %v3367_v36 = vld [vmem:[#allocation5 + $0x7c4] ss:$16 sps:$4 sm:$0xff]   ;;  %v3370_v37 = vld [vmem:[#allocation5 + $0x7cc] ss:$16 sps:$4 sm:$0xff]  }
 0x1a4   :  { %2041 = vmatprep.subr.bf16.mxu0 %v3289_v38  ;;  %2205 = vmatprep.subr.bf16.mxu1 %v3292_v39  ;;  %v3365_v38 = vld [vmem:[#allocation5 + $0x7c0] ss:$16 sps:$4 sm:$0xff]   ;;  %v3368_v39 = vld [vmem:[#allocation5 + $0x7c8] ss:$16 sps:$4 sm:$0xff]  }
 0x1a5   :  { %2071 = vmatprep.mubr.bf16.mxu0 %v357_v18  ;;  %2235 = vmatprep.mubr.bf16.mxu1 %v357_v18  ;;  %v336_v18 = vadd.f32 %v3630_v15, %v100_v35  ;;  %v3381_v15 = vld [vmem:[#allocation7 + $0x48] sm:$0xff]  }
 0x1a7   :  { %2042 = vmatpush1.bf16.msra.mxu0 %v3287_v41  ;;  %2206 = vmatpush1.bf16.msra.mxu1 %v3290_v42  ;;  %v3373_v41 = vld [vmem:[#allocation5 + $0x7e4] ss:$16 sps:$4 sm:$0xff]   ;;  %v3376_v42 = vld [vmem:[#allocation5 + $0x7ec] ss:$16 sps:$4 sm:$0xff]  }
 0x1a8   :  { %2043 = vmatprep.subr.bf16.mxu0 %v3295_v43  ;;  %2207 = vmatprep.subr.bf16.mxu1 %v3298_v44  ;;  %v3371_v43 = vld [vmem:[#allocation5 + $0x7e0] ss:$16 sps:$4 sm:$0xff]   ;;  %v3374_v44 = vld [vmem:[#allocation5 + $0x7e8] ss:$16 sps:$4 sm:$0xff]  }
 0x1ab   :  { %2044 = vmatpush1.bf16.msra.mxu0 %v3293_v45  ;;  %2208 = vmatpush1.bf16.msra.mxu1 %v3296_v46  ;;  %v348_v45 = vmax.f32 %v336_v18, 0.0  ;;  %v3378_v46 = vld [vmem:[#allocation7 + $0xc0] sm:$0xff]  }
 0x1ac   :  { %2045 = vmatprep.subr.bf16.mxu0 %v3301_v47  ;;  %2209 = vmatprep.subr.bf16.mxu1 %v3304_v48  ;;  %v3379_v47 = vld [vmem:[#allocation7] sm:$0xff]  }
 0x1ad   :  { %v3380_v48 = vld [vmem:[#allocation7 + $0x80] sm:$0xff]  }
 0x1af   :  { %2046 = vmatpush1.bf16.msra.mxu0 %v3299_v49  ;;  %2210 = vmatpush1.bf16.msra.mxu1 %v3302_v51  ;;  %v356_v49 = vpack.c.bf16 %v348_v45, %v348_v45  ;;  %v3382_v51 = vld [vmem:[#allocation7 + $0xc8] sm:$0xff]  }
 0x1b0   :  { %2047 = vmatprep.subr.bf16.mxu0 %v3307_v52  ;;  %2211 = vmatprep.subr.bf16.mxu1 %v3310_v53  ;;  %v3383_v52 = vld [vmem:[#allocation7 + $0x8] sm:$0xff]  }
 0x1b1   :  { %v3384_v53 = vld [vmem:[#allocation7 + $0x88] sm:$0xff]  }
 0x1b3   :  { %2048 = vmatpush1.bf16.msra.mxu0 %v3305_v54  ;;  %2212 = vmatpush1.bf16.msra.mxu1 %v3308_v55  ;;  %v3385_v54 = vld [vmem:[#allocation7 + $0x50] sm:$0xff]  }
 0x1b4   :  { %2049 = vmatprep.subr.bf16.mxu0 %v3313_v58  ;;  %2213 = vmatprep.subr.bf16.mxu1 %v3316_v59  ;;  %v3386_v55 = vld [vmem:[#allocation7 + $0xd0] sm:$0xff]  }
 0x1b5   :  { %v3387_v58 = vld [vmem:[#allocation7 + $0x10] sm:$0xff]  }
 0x1b6   :  { %v3388_v59 = vld [vmem:[#allocation7 + $0x90] sm:$0xff]  }
 0x1b7   :  { %2050 = vmatpush1.bf16.msra.mxu0 %v3311_v60  ;;  %2214 = vmatpush1.bf16.msra.mxu1 %v3314_v61  ;;  %v3389_v60 = vld [vmem:[#allocation7 + $0x58] sm:$0xff]  }
 0x1b8   :  { %2051 = vmatprep.subr.bf16.mxu0 %v3319_v62  ;;  %2215 = vmatprep.subr.bf16.mxu1 %v3322_v63  ;;  %v3390_v61 = vld [vmem:[#allocation7 + $0xd8] sm:$0xff]  }
 0x1b9   :  { %v3391_v62 = vld [vmem:[#allocation7 + $0x18] sm:$0xff]  }
 0x1ba   :  { %v3392_v63 = vld [vmem:[#allocation7 + $0x98] sm:$0xff]  }
 0x1bb   :  { %2052 = vmatpush1.bf16.msra.mxu0 %v3317_v0  ;;  %2216 = vmatpush1.bf16.msra.mxu1 %v3320_v1  ;;  %v3393_v0 = vld [vmem:[#allocation7 + $0x60] sm:$0xff]  }
 0x1bc   :  { %2053 = vmatprep.subr.bf16.mxu0 %v3325_v2  ;;  %2217 = vmatprep.subr.bf16.mxu1 %v3328_v3  ;;  %v3394_v1 = vld [vmem:[#allocation7 + $0xe0] sm:$0xff]  }
 0x1bd   :  { %v3395_v2 = vld [vmem:[#allocation7 + $0x20] sm:$0xff]  }
 0x1be   :  { %v3396_v3 = vld [vmem:[#allocation7 + $0xa0] sm:$0xff]  }
 0x1bf   :  { %2054 = vmatpush1.bf16.msra.mxu0 %v3323_v5  ;;  %2218 = vmatpush1.bf16.msra.mxu1 %v3326_v6  ;;  %v3397_v5 = vld [vmem:[#allocation7 + $0x68] sm:$0xff]  }
 0x1c0   :  { %2055 = vmatprep.subr.bf16.mxu0 %v3331_v7  ;;  %2219 = vmatprep.subr.bf16.mxu1 %v3334_v8  ;;  %v3398_v6 = vld [vmem:[#allocation7 + $0xe8] sm:$0xff]  }
 0x1c1   :  { %v3399_v7 = vld [vmem:[#allocation7 + $0x28] sm:$0xff]  }
 0x1c2   :  { %v3400_v8 = vld [vmem:[#allocation7 + $0xa8] sm:$0xff]  }
 0x1c3   :  { %2056 = vmatpush1.bf16.msra.mxu0 %v3329_v9  ;;  %2220 = vmatpush1.bf16.msra.mxu1 %v3332_v10  ;;  %v3401_v9 = vld [vmem:[#allocation7 + $0x70] sm:$0xff]  }
 0x1c4   :  { %2057 = vmatprep.subr.bf16.mxu0 %v3337_v11  ;;  %2221 = vmatprep.subr.bf16.mxu1 %v3340_v40  ;;  %v3402_v10 = vld [vmem:[#allocation7 + $0xf0] sm:$0xff]  }
 0x1c5   :  { %v3403_v11 = vld [vmem:[#allocation7 + $0x30] sm:$0xff]  }
 0x1c6   :  { %v3404_v40 = vld [vmem:[#allocation7 + $0xb0] sm:$0xff]  }
 0x1c7   :  { %2058 = vmatpush1.bf16.msra.mxu0 %v3335_v12  ;;  %2222 = vmatpush1.bf16.msra.mxu1 %v3338_v13  ;;  %v3405_v12 = vld [vmem:[#allocation7 + $0x78] sm:$0xff]  }
 0x1c8   :  { %2059 = vmatprep.subr.bf16.mxu0 %v3343_v14  ;;  %2223 = vmatprep.subr.bf16.mxu1 %v3346_v16  ;;  %v3406_v13 = vld [vmem:[#allocation7 + $0xf8] sm:$0xff]  }
 0x1c9   :  { %v3407_v14 = vld [vmem:[#allocation7 + $0x38] sm:$0xff]  }
 0x1ca   :  { %v3408_v16 = vld [vmem:[#allocation7 + $0xb8] sm:$0xff]  }
 0x1cb   :  { %2060 = vmatpush1.bf16.msra.mxu0 %v3341_v17  ;;  %2224 = vmatpush1.bf16.msra.mxu1 %v3344_v57  ;;  %v614_v17 = vld [vmem:[%s3681_s4] sm:$0xf] }
 0x1cc   :  { %2061 = vmatprep.subr.bf16.mxu0 %v3349_v19  ;;  %2225 = vmatprep.subr.bf16.mxu1 %v3352_v20  ;;  %v619_v57 = vrot.slane %v614_v17, %v75_v28  ;;  %v627_v19 = vrot.slane %v614_v17, %v83_v50  ;;  %v623_v20 = vrot.slane %v614_v17, %v79_v30 }
 0x1cf   :  { %2062 = vmatpush1.bf16.msra.mxu0 %v3347_v21  ;;  %2226 = vmatpush1.bf16.msra.mxu1 %v3350_v22  ;;  %v631_v21 = vrot.slane %v614_v17, %v87_v31 }
 0x1d0   :  { %2063 = vmatprep.subr.bf16.mxu0 %v3355_v23  ;;  %2227 = vmatprep.subr.bf16.mxu1 %v3358_v24 }
 0x1d3   :  { %2064 = vmatpush1.bf16.msra.mxu0 %v3353_v25  ;;  %2228 = vmatpush1.bf16.msra.mxu1 %v3356_v26 }
 0x1d4   :  { %2065 = vmatprep.subr.bf16.mxu0 %v3361_v32  ;;  %2229 = vmatprep.subr.bf16.mxu1 %v3364_v33 }
 0x1d7   :  { %2066 = vmatpush1.bf16.msra.mxu0 %v3359_v34  ;;  %2230 = vmatpush1.bf16.msra.mxu1 %v3362_v56 }
 0x1d8   :  { %2067 = vmatprep.subr.bf16.mxu0 %v3367_v36  ;;  %2231 = vmatprep.subr.bf16.mxu1 %v3370_v37 }
 0x1db   :  { %2068 = vmatpush1.bf16.msra.mxu0 %v3365_v38  ;;  %2232 = vmatpush1.bf16.msra.mxu1 %v3368_v39 }
 0x1dc   :  { %2069 = vmatprep.subr.bf16.mxu0 %v3373_v41  ;;  %2233 = vmatprep.subr.bf16.mxu1 %v3376_v42  ;;  %v2876_v42 = vld [vmem:[%s3683_s6] ss:$0 sm:$0xff] }
 0x1df   :  { %2070 = vmatpush1.bf16.msra.mxu0 %v3371_v43  ;;  %2234 = vmatpush1.bf16.msra.mxu1 %v3374_v44 }
 0x1e0   :  { %2909 = vmatprep.subr.bf16.mxu0 %v3377_v29  ;;  %2931 = vmatprep.subr.bf16.mxu1 %v3378_v46 }
 0x1e2   :  { %2072 = vmatmul.mubr.bf16.vlgmr.msra.gmra.mrb[8].mxu0 %v356_v49  ;;  %2236 = vmatmul.mubr.bf16.vlgmr.msra.gmra.mrb[8].mxu1 %v356_v49 }
 0x1e3   :  { %2910 = vmatpush3.bf16.msra.mxu0 %v3379_v47  ;;  %2932 = vmatpush3.bf16.msra.mxu1 %v3380_v48 }
 0x1e4   :  { %2911 = vmatprep.subr.bf16.mxu0 %v3381_v15  ;;  %2933 = vmatprep.subr.bf16.mxu1 %v3382_v51 }
 0x1e7   :  { %2912 = vmatpush3.bf16.msra.mxu0 %v3383_v52  ;;  %2934 = vmatpush3.bf16.msra.mxu1 %v3384_v53 }
 0x1e8   :  { %2913 = vmatprep.subr.bf16.mxu0 %v3385_v54  ;;  %2935 = vmatprep.subr.bf16.mxu1 %v3386_v55 }
 0x1eb   :  { %2914 = vmatpush3.bf16.msra.mxu0 %v3387_v58  ;;  %2936 = vmatpush3.bf16.msra.mxu1 %v3388_v59 }
 0x1ec   :  { %2915 = vmatprep.subr.bf16.mxu0 %v3389_v60  ;;  %2937 = vmatprep.subr.bf16.mxu1 %v3390_v61 }
 0x1ef   :  { %2916 = vmatpush3.bf16.msra.mxu0 %v3391_v62  ;;  %2938 = vmatpush3.bf16.msra.mxu1 %v3392_v63 }
 0x1f0   :  { %2917 = vmatprep.subr.bf16.mxu0 %v3393_v0  ;;  %2939 = vmatprep.subr.bf16.mxu1 %v3394_v1 }
 0x1f3   :  { %2918 = vmatpush3.bf16.msra.mxu0 %v3395_v2  ;;  %2940 = vmatpush3.bf16.msra.mxu1 %v3396_v3 }
 0x1f4   :  { %2919 = vmatprep.subr.bf16.mxu0 %v3397_v5  ;;  %2941 = vmatprep.subr.bf16.mxu1 %v3398_v6 }
 0x1f7   :  { %2920 = vmatpush3.bf16.msra.mxu0 %v3399_v7  ;;  %2942 = vmatpush3.bf16.msra.mxu1 %v3400_v8 }
 0x1f8   :  { %2921 = vmatprep.subr.bf16.mxu0 %v3401_v9  ;;  %2943 = vmatprep.subr.bf16.mxu1 %v3402_v10 }
 0x1fb   :  { %2922 = vmatpush3.bf16.msra.mxu0 %v3403_v11  ;;  %2944 = vmatpush3.bf16.msra.mxu1 %v3404_v40 }
 0x1fc   :  { %2923 = vmatprep.subr.bf16.mxu0 %v3405_v12  ;;  %2945 = vmatprep.subr.bf16.mxu1 %v3406_v13 }
 0x1ff   :  { %2924 = vmatpush3.bf16.msra.mxu0 %v3407_v14  ;;  %2946 = vmatpush3.bf16.msra.mxu1 %v3408_v16 }
 0x2b5   :  { %v2073_v22 = vpop.f32.mrb[8].mxu0  ;;  %v2237_v23 = vpop.f32.mrb[8].mxu1 }
 0x2b6   :  { %v2953_v24 = vadd.f32 %v2073_v22, %v619_v57  ;;  %v2955_v25 = vadd.f32 %v2237_v23, %v627_v19  ;;  %v2075_v26 = vpop.f32.mrb[9].mxu0  ;;  %v2239_v27 = vpop.f32.mrb[9].mxu1 }
 0x2b7   :  { %v2954_v32 = vadd.f32 %v2075_v26, %v623_v20  ;;  %v2956_v33 = vadd.f32 %v2239_v27, %v631_v21  ;;  %v2077_v34 = vpop.f32.mrb[10].mxu0  ;;  %v2241_v56 = vpop.f32.mrb[10].mxu1 }
 0x2b8   :  { %v2244_v28 = vmax.f32 %v2953_v24, 0.0  ;;  %v2246_v35 = vmax.f32 %v2955_v25, 0.0  ;;  %v2078_v36 = vpop.f32.mrb[11].mxu0  ;;  %v2242_v50 = vpop.f32.mrb[11].mxu1 }
 0x2b9   :  { %v2245_v37 = vmax.f32 %v2954_v32, 0.0  ;;  %v2247_v38 = vmax.f32 %v2956_v33, 0.0 }
 0x2ba   :  { %v2248_v4 = vpack.c.bf16 %v2244_v28, %v2244_v28  ;;  %v2250_v31 = vpack.c.bf16 %v2246_v35, %v2246_v35 }
 0x2bb   :  { %v2249_v30 = vpack.c.bf16 %v2245_v37, %v2245_v37  ;;  %v2251_v39 = vpack.c.bf16 %v2247_v38, %v2247_v38 }
 0x2bd   :  { %2547 = vmatprep.mubr.bf16.mxu0 %v2249_v30  ;;  %2587 = vmatprep.mubr.bf16.mxu1 %v2251_v39 }
 0x2be   :  { %2548 = vmatmul.mubr.bf16.vlgmr.msra.gmra.mrb[12].mxu0 %v2248_v4  ;;  %2588 = vmatmul.mubr.bf16.vlgmr.msra.gmra.mrb[12].mxu1 %v2250_v31 }
 0x391   :  { %v2925_v18 = vpop.f32.mrb[12].mxu0  ;;  %v2947_v41 = vpop.f32.mrb[12].mxu1 }
 0x392   :  { %v2926_v43 = vpop.f32.mrb[13].mxu0  ;;  %v2948_v44 = vpop.f32.mrb[13].mxu1 }
 0x393   :  { %v2927_v45 = vadd.f32 %v2926_v43, %v2925_v18  ;;  %v2949_v29 = vadd.f32 %v2948_v44, %v2947_v41  ;;  %v2928_v46 = vpop.f32.mrb[14].mxu0  ;;  %v2950_v47 = vpop.f32.mrb[14].mxu1 }
 0x394   :  { %v2929_v48 = vpop.f32.mrb[15].mxu0  ;;  %v2951_v49 = vpop.f32.mrb[15].mxu1 }
 0x395   :  { %v2550_v15 = vadd.f32 %v2927_v45, %v2876_v42 }
 0x397   :  { %v2590_v51 = vadd.f32 %v2949_v29, %v2550_v15 }
 0x399   :  { %2595 = vst [vmem:[#allocation8] sm:$0xff] %v2590_v51 }
 0x39a   :  { %3486 = shalt.err (!%p3483_p0)
}
 0x39b   :  { %s3487_s24 = scalar_lea.hbm %s3684_s7, 128 }
 0x39c   :  { %p3488_p1 = scmp.ne.s32.totalorder %s3684_s7, %s3487_s24  ;;  %p3491_p2 = scmp.lt.u32.totalorder %s3487_s24, %s3684_s7 }
 0x39e   :  { %p3493_p3 = pnand %p3491_p2, %p3488_p1 }
 0x3a0   :  { %3496 = shalt.err (!%p3493_p3)
}
 0x3a1   :  { %2605 = dma.vmem_to_hbm [thread:$0]  %s2603_s21, 128, %s3684_s7, [#allocation4]  }
 0x3a2   :  { %3501 = dma.done.wait [#allocation4], 128  }
 0x3a3   :  { %3502 = vsyncadd [#allocation4], 4294967168 }
 0x3a4   :  { %2609 = vsyncpa [#allocation3], 1 }
 0x3a5   :  { %2610 = vsyncpa [#allocation6], 1 }
 0x3a6   :  { %2611 = vsyncpa [#allocation4], 1 }

</bundles_post_ra>
